<compile_context>
chip_gen: v6e
topology: v6e:2x2x1
jax: 0.10.0
libtpu: 0.0.40
codegen_flags: <defaults>
</compile_context>

<pallas_src>
import functools
import math

import jax
import jax.numpy as jnp
import numpy as np
from jax.experimental import pallas as pl
from jax.experimental.pallas import tpu as pltpu


def _round_up(x, m):
    return (x + m - 1) // m * m


def _sigmoid(x):
    # Manual form: exp on the EUP, divide on the VPU -- guaranteed lowering.
    return 1.0 / (1.0 + jnp.exp(-x))


def _ppo_lstm_kernel(x_ref, hx_ref, cx_ref,
                     w_gates_ref, b_gates_ref, w_head_ref, b_head_ref,
                     head_ref, hx_out_ref, cx_out_ref):
    """Fused LSTMCell step + actor/critic heads.  Single grid point.

    Shapes (all whole-array VMEM blocks):
      x_ref       (B, In)      f32
      hx_ref      (B, H)       f32   (aliased with hx_out_ref)
      cx_ref      (B, H)       f32   (aliased with cx_out_ref)
      w_gates_ref (In+H, 4H)   bf16  = [W_ih^T ; W_hh^T]
      b_gates_ref (1, 4H)      f32   = b_ih + b_hh
      w_head_ref  (H, P)       bf16  = [W_actor^T | W_critic^T | 0-pad]
      b_head_ref  (1, P)       f32
      head_ref    (B, P)       f32   (actor = cols [0:A], critic = col A)
      hx_out_ref  (B, H)       f32
      cx_out_ref  (B, H)       f32
    """
    H = hx_ref.shape[1]

    # Fused gate matmul: one MXU call, bf16 operands, f32 accumulation.
    xh = jnp.concatenate([x_ref[...], hx_ref[...]], axis=1).astype(jnp.bfloat16)
    gates = jnp.dot(xh, w_gates_ref[...],
                    preferred_element_type=jnp.float32) + b_gates_ref[...]

    # PyTorch gate order along 4H: i, f, g, o.  H % 128 == 0 -> aligned slices.
    i_g = _sigmoid(gates[:, 0 * H:1 * H])
    f_g = _sigmoid(gates[:, 1 * H:2 * H])
    g_g = jnp.tanh(gates[:, 2 * H:3 * H])
    o_g = _sigmoid(gates[:, 3 * H:4 * H])

    # Cell / hidden update kept in f32 on the VPU (v5e has no bf16 VPU/EUP).
    c_new = f_g * cx_ref[...] + i_g * g_g
    h_new = o_g * jnp.tanh(c_new)
    cx_out_ref[...] = c_new
    hx_out_ref[...] = h_new

    # Fused lane-dense actor+critic head: one (B, P) matmul, P % 128 == 0.
    head = jnp.dot(h_new.astype(jnp.bfloat16), w_head_ref[...],
                   preferred_element_type=jnp.float32) + b_head_ref[...]
    head_ref[...] = head


def make_fused_params(params, hidden_size, output_size):
    """One-time repacking of PyTorch-layout weights into the kernel layout.

    Done once (outside the step loop) so the per-step kernel HBM traffic is
    exactly the weight bytes, with no per-call transposes/concats.
    """
    w_gates = jnp.concatenate(
        [params["w_ih"].T, params["w_hh"].T], axis=0).astype(jnp.bfloat16)
    b_gates = (params["b_ih"] + params["b_hh"]).astype(jnp.float32)
    b_gates = b_gates.reshape(1, 4 * hidden_size)

    head_dim = output_size + 1
    padded_head = _round_up(head_dim, 128)
    w_head = jnp.zeros((hidden_size, padded_head), jnp.float32)
    w_head = w_head.at[:, :output_size].set(params["w_actor"].T)
    w_head = w_head.at[:, output_size:head_dim].set(params["w_critic"].T)
    w_head = w_head.astype(jnp.bfloat16)

    b_head = jnp.zeros((1, padded_head), jnp.float32)
    b_head = b_head.at[0, :output_size].set(params["b_actor"])
    b_head = b_head.at[0, output_size:head_dim].set(params["b_critic"])

    return {"w_gates": w_gates, "b_gates": b_gates,
            "w_head": w_head, "b_head": b_head}


def ppo_policy_lstm_forward(obs, hx, cx, fused_params, *, output_size):
    """obs: (B, C, Hs, Ws).  Returns (actor (B,A), critic (B,1), (hx', cx'))."""
    B = obs.shape[0]
    x = obs.reshape(B, -1).astype(jnp.float32)      # flatten NCHW -> (B, In)
    input_size = x.shape[1]
    hidden_size = hx.shape[1]

    # Pad batch up to a sublane multiple (8 for f32) so VPU ops are unmasked.
    Bp = _round_up(max(B, 1), 8)
    if Bp != B:
        pad = ((0, Bp - B), (0, 0))
        x = jnp.pad(x, pad)
        hx = jnp.pad(hx, pad)
        cx = jnp.pad(cx, pad)

    w_gates = fused_params["w_gates"]
    b_gates = fused_params["b_gates"]
    w_head = fused_params["w_head"]
    b_head = fused_params["b_head"]
    P = w_head.shape[1]

    flops = (2 * Bp * (input_size + hidden_size) * 4 * hidden_size
             + 2 * Bp * hidden_size * P)
    transcendentals = 5 * Bp * hidden_size          # 3 sigmoid + 2 tanh per unit
    bytes_accessed = (w_gates.size * 2 + w_head.size * 2
                      + (b_gates.size + b_head.size) * 4
                      + (x.size + 2 * hx.size + 2 * cx.size + Bp * P) * 4)

    vmem_spec = pl.BlockSpec(memory_space=pltpu.MemorySpace.VMEM)

    head, hx_new, cx_new = pl.pallas_call(
        _ppo_lstm_kernel,
        out_shape=(
            jax.ShapeDtypeStruct((Bp, P), jnp.float32),
            jax.ShapeDtypeStruct((Bp, hidden_size), jnp.float32),
            jax.ShapeDtypeStruct((Bp, hidden_size), jnp.float32),
        ),
        in_specs=[vmem_spec] * 7,
        out_specs=(vmem_spec, vmem_spec, vmem_spec),
        # Recurrent state is written in place (no extra HBM round trip).
        input_output_aliases={1: 1, 2: 2},
        cost_estimate=pl.CostEstimate(
            flops=flops,
            transcendentals=transcendentals,
            bytes_accessed=bytes_accessed),
        compiler_params=pltpu.CompilerParams(
            vmem_limit_bytes=32 * 1024 * 1024),
    )(x, hx, cx, w_gates, b_gates, w_head, b_head)

    actor = head[:B, :output_size]
    critic = head[:B, output_size:output_size + 1]
    return actor, critic, (hx_new[:B], cx_new[:B])


def ppo_policy_lstm_reference(obs, hx, cx, params):
    """Pure-JAX f32 reference mirroring the PyTorch module."""
    B = obs.shape[0]
    x = obs.reshape(B, -1).astype(jnp.float32)
    H = hx.shape[1]
    gates = (x @ params["w_ih"].T + params["b_ih"]
             + hx @ params["w_hh"].T + params["b_hh"])
    i = jax.nn.sigmoid(gates[:, 0 * H:1 * H])
    f = jax.nn.sigmoid(gates[:, 1 * H:2 * H])
    g = jnp.tanh(gates[:, 2 * H:3 * H])
    o = jax.nn.sigmoid(gates[:, 3 * H:4 * H])
    c = f * cx + i * g
    h = o * jnp.tanh(c)
    actor = h @ params["w_actor"].T + params["b_actor"]
    critic = h @ params["w_critic"].T + params["b_critic"]
    return actor, critic, (h, c)


if __name__ == "__main__":
    # Small demo shapes consistent with the module: obs (B, C, Hs, Ws) is
    # flattened to input_size = C*Hs*Ws; hidden/actions chosen 128-friendly.
    B, C, Hs, Ws = 8, 4, 16, 16
    input_size = C * Hs * Ws          # 1024
    hidden_size = 128                 # 4H = 512 (multiple of 256)
    output_size = 4                   # Breakout-style action count

    key = jax.random.PRNGKey(0)
    ks = jax.random.split(key, 11)
    k = 1.0 / math.sqrt(hidden_size)

    params = {
        "w_ih": jax.random.uniform(ks[0], (4 * hidden_size, input_size),
                                   jnp.float32, -k, k),
        "w_hh": jax.random.uniform(ks[1], (4 * hidden_size, hidden_size),
                                   jnp.float32, -k, k),
        "b_ih": jax.random.uniform(ks[2], (4 * hidden_size,), jnp.float32, -k, k),
        "b_hh": jax.random.uniform(ks[3], (4 * hidden_size,), jnp.float32, -k, k),
        "w_actor": jax.random.uniform(ks[4], (output_size, hidden_size),
                                      jnp.float32, -k, k),
        "b_actor": jax.random.uniform(ks[5], (output_size,), jnp.float32, -k, k),
        "w_critic": jax.random.uniform(ks[6], (1, hidden_size), jnp.float32, -k, k),
        "b_critic": jax.random.uniform(ks[7], (1,), jnp.float32, -k, k),
    }

    obs = jax.random.normal(ks[8], (B, C, Hs, Ws), jnp.float32)
    hx0 = 0.1 * jax.random.normal(ks[9], (B, hidden_size), jnp.float32)
    cx0 = 0.1 * jax.random.normal(ks[10], (B, hidden_size), jnp.float32)

    # Repack weights once (transposes / concats / padding live outside the
    # per-step path).
    fused = make_fused_params(params, hidden_size, output_size)

    # Reference computed first (hx0/cx0 are donated into the kernel call).
    a_ref, c_ref, (h_ref, cc_ref) = ppo_policy_lstm_reference(obs, hx0, cx0, params)
    a_ref, c_ref, h_ref, cc_ref = map(np.asarray, (a_ref, c_ref, h_ref, cc_ref))

    fwd = jax.jit(functools.partial(ppo_policy_lstm_forward,
                                    output_size=output_size),
                  donate_argnums=(1, 2))
    actor, critic, (hx1, cx1) = fwd(obs, hx0, cx0, fused)
    jax.block_until_ready((actor, critic, hx1, cx1))

    assert actor.shape == (B, output_size)
    assert critic.shape == (B, 1)
    assert hx1.shape == (B, hidden_size) and cx1.shape == (B, hidden_size)

    # bf16 MXU operands with f32 accumulation -> loose tolerance vs f32 ref.
    np.testing.assert_allclose(np.asarray(actor), a_ref, atol=5e-2, rtol=5e-2)
    np.testing.assert_allclose(np.asarray(critic), c_ref, atol=5e-2, rtol=5e-2)
    np.testing.assert_allclose(np.asarray(hx1), h_ref, atol=5e-2, rtol=5e-2)
    np.testing.assert_allclose(np.asarray(cx1), cc_ref, atol=5e-2, rtol=5e-2)

    print("KERNEL_OK")
</pallas_src>

<mosaic_0001>
module attributes {stable_mosaic.version = 11 : i64} {
  func.func @_ppo_lstm_kernel(%arg0: memref<8x1024xf32, #tpu.memory_space<vmem>>, %arg1: memref<8x128xf32, #tpu.memory_space<vmem>>, %arg2: memref<8x128xf32, #tpu.memory_space<vmem>>, %arg3: memref<1152x512xbf16, #tpu.memory_space<vmem>>, %arg4: memref<1x512xf32, #tpu.memory_space<vmem>>, %arg5: memref<128x128xbf16, #tpu.memory_space<vmem>>, %arg6: memref<1x128xf32, #tpu.memory_space<vmem>>, %arg7: memref<8x128xf32, #tpu.memory_space<vmem>>, %arg8: memref<8x128xf32, #tpu.memory_space<vmem>>, %arg9: memref<8x128xf32, #tpu.memory_space<vmem>>) attributes {dimension_semantics = [], scalar_prefetch = 0 : i64, scratch_operands = 0 : i64, tpu.core_type = #tpu.core_type<tc>} {
    %c0 = arith.constant 0 : index
    %c0_0 = arith.constant 0 : index
    %0 = vector.load %arg0[%c0, %c0_0] : memref<8x1024xf32, #tpu.memory_space<vmem>>, vector<8x1024xf32>
    %c0_1 = arith.constant 0 : index
    %c0_2 = arith.constant 0 : index
    %1 = vector.load %arg1[%c0_1, %c0_2] : memref<8x128xf32, #tpu.memory_space<vmem>>, vector<8x128xf32>
    %2 = tpu.concatenate %0, %1 in 1 : vector<8x1024xf32>, vector<8x128xf32> -> vector<8x1152xf32>
    %3 = arith.truncf %2 : vector<8x1152xf32> to vector<8x1152xbf16>
    %c0_3 = arith.constant 0 : index
    %c0_4 = arith.constant 0 : index
    %4 = vector.load %arg3[%c0_3, %c0_4] : memref<1152x512xbf16, #tpu.memory_space<vmem>>, vector<1152x512xbf16>
    %cst = arith.constant dense<0.000000e+00> : vector<8x512xf32>
    %5 = tpu.matmul %3, %4, %cst {dimension_numbers = #tpu.dot_dimension_numbers<[1], [0], [0], [1], [0, 0, 1, 1], [], []>} : vector<8x1152xbf16>, vector<1152x512xbf16>, vector<8x512xf32> -> vector<8x512xf32>
    %c0_5 = arith.constant 0 : index
    %c0_6 = arith.constant 0 : index
    %6 = vector.load %arg4[%c0_5, %c0_6] : memref<1x512xf32, #tpu.memory_space<vmem>>, vector<1x512xf32>
    %7 = vector.broadcast %6 : vector<1x512xf32> to vector<8x512xf32>
    %8 = arith.addf %5, %7 : vector<8x512xf32>
    %9 = vector.extract_strided_slice %8 {offsets = [0, 0], sizes = [8, 128], strides = [1, 1]} : vector<8x512xf32> to vector<8x128xf32>
    %cst_7 = arith.constant 0.000000e+00 : f32
    %10 = vector.broadcast %cst_7 : f32 to vector<8x128xf32>
    %11 = arith.subf %10, %9 : vector<8x128xf32>
    %12 = math.exp %11 : vector<8x128xf32>
    %cst_8 = arith.constant 1.000000e+00 : f32
    %13 = vector.broadcast %cst_8 : f32 to vector<8x128xf32>
    %14 = arith.addf %13, %12 : vector<8x128xf32>
    %cst_9 = arith.constant 1.000000e+00 : f32
    %15 = vector.broadcast %cst_9 : f32 to vector<8x128xf32>
    %16 = arith.divf %15, %14 : vector<8x128xf32>
    %17 = vector.extract_strided_slice %8 {offsets = [0, 128], sizes = [8, 128], strides = [1, 1]} : vector<8x512xf32> to vector<8x128xf32>
    %cst_10 = arith.constant 0.000000e+00 : f32
    %18 = vector.broadcast %cst_10 : f32 to vector<8x128xf32>
    %19 = arith.subf %18, %17 : vector<8x128xf32>
    %20 = math.exp %19 : vector<8x128xf32>
    %cst_11 = arith.constant 1.000000e+00 : f32
    %21 = vector.broadcast %cst_11 : f32 to vector<8x128xf32>
    %22 = arith.addf %21, %20 : vector<8x128xf32>
    %cst_12 = arith.constant 1.000000e+00 : f32
    %23 = vector.broadcast %cst_12 : f32 to vector<8x128xf32>
    %24 = arith.divf %23, %22 : vector<8x128xf32>
    %25 = vector.extract_strided_slice %8 {offsets = [0, 256], sizes = [8, 128], strides = [1, 1]} : vector<8x512xf32> to vector<8x128xf32>
    %26 = math.tanh %25 : vector<8x128xf32>
    %27 = vector.extract_strided_slice %8 {offsets = [0, 384], sizes = [8, 128], strides = [1, 1]} : vector<8x512xf32> to vector<8x128xf32>
    %cst_13 = arith.constant 0.000000e+00 : f32
    %28 = vector.broadcast %cst_13 : f32 to vector<8x128xf32>
    %29 = arith.subf %28, %27 : vector<8x128xf32>
    %30 = math.exp %29 : vector<8x128xf32>
    %cst_14 = arith.constant 1.000000e+00 : f32
    %31 = vector.broadcast %cst_14 : f32 to vector<8x128xf32>
    %32 = arith.addf %31, %30 : vector<8x128xf32>
    %cst_15 = arith.constant 1.000000e+00 : f32
    %33 = vector.broadcast %cst_15 : f32 to vector<8x128xf32>
    %34 = arith.divf %33, %32 : vector<8x128xf32>
    %c0_16 = arith.constant 0 : index
    %c0_17 = arith.constant 0 : index
    %35 = vector.load %arg2[%c0_16, %c0_17] : memref<8x128xf32, #tpu.memory_space<vmem>>, vector<8x128xf32>
    %36 = arith.mulf %24, %35 : vector<8x128xf32>
    %37 = arith.mulf %16, %26 : vector<8x128xf32>
    %38 = arith.addf %36, %37 : vector<8x128xf32>
    %39 = math.tanh %38 : vector<8x128xf32>
    %40 = arith.mulf %34, %39 : vector<8x128xf32>
    %c0_18 = arith.constant 0 : index
    %c0_19 = arith.constant 0 : index
    %41 = vector.load %arg9[%c0_18, %c0_19] : memref<8x128xf32, #tpu.memory_space<vmem>>, vector<8x128xf32>
    tpu.vector_store %arg9[%c0_18, %c0_19], %38 {strides = array<i32>} : memref<8x128xf32, #tpu.memory_space<vmem>>, vector<8x128xf32>,
    %c0_20 = arith.constant 0 : index
    %c0_21 = arith.constant 0 : index
    %42 = vector.load %arg8[%c0_20, %c0_21] : memref<8x128xf32, #tpu.memory_space<vmem>>, vector<8x128xf32>
    tpu.vector_store %arg8[%c0_20, %c0_21], %40 {strides = array<i32>} : memref<8x128xf32, #tpu.memory_space<vmem>>, vector<8x128xf32>,
    %43 = arith.truncf %40 : vector<8x128xf32> to vector<8x128xbf16>
    %c0_22 = arith.constant 0 : index
    %c0_23 = arith.constant 0 : index
    %44 = vector.load %arg5[%c0_22, %c0_23] : memref<128x128xbf16, #tpu.memory_space<vmem>>, vector<128x128xbf16>
    %cst_24 = arith.constant dense<0.000000e+00> : vector<8x128xf32>
    %45 = tpu.matmul %43, %44, %cst_24 {dimension_numbers = #tpu.dot_dimension_numbers<[1], [0], [0], [1], [0, 0, 1, 1], [], []>} : vector<8x128xbf16>, vector<128x128xbf16>, vector<8x128xf32> -> vector<8x128xf32>
    %c0_25 = arith.constant 0 : index
    %c0_26 = arith.constant 0 : index
    %46 = vector.load %arg6[%c0_25, %c0_26] : memref<1x128xf32, #tpu.memory_space<vmem>>, vector<1x128xf32>
    %47 = vector.broadcast %46 : vector<1x128xf32> to vector<8x128xf32>
    %48 = arith.addf %45, %47 : vector<8x128xf32>
    %c0_27 = arith.constant 0 : index
    %c0_28 = arith.constant 0 : index
    %49 = vector.load %arg7[%c0_27, %c0_28] : memref<8x128xf32, #tpu.memory_space<vmem>>, vector<8x128xf32>
    tpu.vector_store %arg7[%c0_27, %c0_28], %48 {strides = array<i32>} : memref<8x128xf32, #tpu.memory_space<vmem>>, vector<8x128xf32>,
    return
  }
}

</mosaic_0001>

<bundles_post_ra>
// kernel: ppo_policy_lstm_forward.1
= control target key start
LH: loop header
LB: loop body
LE: loop exit
PB: predicated region body
PF: predicated region fallthrough
CT: control target
= control target key end

     0   :  { %15 = vsyncpa [#allocation3], 0  ;;  %s3595_s0 = inlined_call_operand.vmem [shape: f32[8,1024], index: 0, kind: input, shape index: {}]   ;;  %s3596_s1 = inlined_call_operand.hbm [shape: f32[8,128], index: 1, kind: input, shape index: {}, may-alias: {1,8}]   ;;  %s3597_s2 = inlined_call_operand.hbm [shape: f32[8,128], index: 2, kind: input, shape index: {}, may-alias: {2,9}]   ;;  %s3598_s3 = inlined_call_operand.hbm [shape: bf16[1152,512], index: 3, kind: input, shape index: {}]   ;;  %s3599_s4 = inlined_call_operand.hbm [shape: f32[1,512], index: 4, kind: input, shape index: {}]   ;;  %s3600_s5 = inlined_call_operand.hbm [shape: bf16[128,128], index: 5, kind: input, shape index: {}]   ;;  %s3601_s6 = inlined_call_operand.hbm [shape: f32[1,128], index: 6, kind: input, shape index: {}]   ;;  %s3602_s7 = inlined_call_operand.vmem [shape: f32[8,128], index: 7, kind: output, shape index: {0}]   ;;  %s3603_s8 = inlined_call_operand.hbm [shape: f32[8,128], index: 8, kind: output, shape index: {1}, may-alias: {1,8}]   ;;  %s3604_s9 = inlined_call_operand.hbm [shape: f32[8,128], index: 9, kind: output, shape index: {2}, may-alias: {2,9}]  }
   0x1   :  { %16 = vsyncpa [#allocation6], 0 }
   0x2   :  { %17 = vsyncpa [#allocation9], 0 }
   0x3   :  { %18 = vsyncpa [#allocation12], 0 }
   0x4   :  { %19 = vsyncpa [#allocation4], 0 }
   0x5   :  { %20 = vsyncpa [#allocation15], 0  ;;  %s3429_s30 = smov [#allocation5]   ;;  %s3430_s11 = smov [#allocation8]  }
   0x6   :  { %s39_s10 = sshll.u32 %s3429_s30, 4  ;;  %s61_s12 = sshll.u32 %s3430_s11, 4  ;;  %s40_s10 = int_to_ptr.vmem [resolvable:$true] %s39_s10  ;;  %s62_s12 = int_to_ptr.vmem [resolvable:$true] %s61_s12 }
   0x7   :  { %s3265_s13 = scalar_lea.vmem %s40_s10, 128  ;;  %p3270_p1 = scmp.lt.s32.totalorder %s40_s10, %s40_s10 }
   0x8   :  { %p3266_p0 = scmp.ne.s32.totalorder %s40_s10, %s3265_s13  ;;  %p3271_p2 = scmp.lt.s32.totalorder %s3265_s13, %s3265_s13 }
   0xa   :  { %p3272_p3 = por %p3271_p2, %p3270_p1 }
   0xc   :  { %p3273_p4 = pnand %p3272_p3, %p3266_p0 }
   0xe   :  { %3276 = shalt.err (!%p3273_p4)
}
   0xf   :  { %42 = dma.hbm_to_vmem [thread:$0]  %s3597_s2, 128, %s40_s10, [#allocation6]  }
  0x10   :  { %s3285_s16 = scalar_lea.vmem %s62_s12, 64  ;;  %p3290_p6 = scmp.lt.s32.totalorder %s62_s12, %s62_s12 }
  0x11   :  { %p3286_p5 = scmp.ne.s32.totalorder %s62_s12, %s3285_s16  ;;  %p3291_p7 = scmp.lt.s32.totalorder %s3285_s16, %s3285_s16 }
  0x13   :  { %p3292_p8 = por %p3291_p7, %p3290_p6 }
  0x15   :  { %p3293_p9 = pnand %p3292_p8, %p3286_p5 }
  0x17   :  { %3296 = shalt.err (!%p3293_p9)
}
  0x18   :  { %64 = dma.hbm_to_vmem [thread:$0]  %s3599_s4, 64, %s62_s12, [#allocation9]  }
  0x19   :  { %s3431_s19 = smov [#allocation2]   ;;  %s3432_s21 = smov [#allocation7]  }
  0x1a   :  { %s29_s20 = sshll.u32 %s3431_s19, 4  ;;  %s48_s22 = sshll.u32 %s3432_s21, 4  ;;  %s30_s20 = int_to_ptr.vmem [resolvable:$true] %s29_s20  ;;  %s49_s22 = int_to_ptr.vmem [resolvable:$true] %s48_s22 }
  0x1b   :  { %s3305_s23 = scalar_lea.vmem %s30_s20, 128  ;;  %p3310_p11 = scmp.lt.s32.totalorder %s30_s20, %s30_s20 }
  0x1c   :  { %p3306_p10 = scmp.ne.s32.totalorder %s30_s20, %s3305_s23  ;;  %p3311_p12 = scmp.lt.s32.totalorder %s3305_s23, %s3305_s23 }
  0x1e   :  { %p3312_p13 = por %p3311_p12, %p3310_p11 }
  0x20   :  { %p3313_p0 = pnand %p3312_p13, %p3306_p10 }
  0x22   :  { %3316 = shalt.err (!%p3313_p0)
}
  0x23   :  { %32 = dma.hbm_to_vmem [thread:$0]  %s3596_s1, 128, %s30_s20, [#allocation3]  }
  0x24   :  { %s3325_s25 = scalar_lea.vmem %s49_s22, 36864  ;;  %p3330_p2 = scmp.lt.s32.totalorder %s49_s22, %s49_s22 }
  0x25   :  { %p3326_p1 = scmp.ne.s32.totalorder %s49_s22, %s3325_s25  ;;  %p3331_p3 = scmp.lt.s32.totalorder %s3325_s25, %s3325_s25 }
  0x27   :  { %p3332_p4 = por %p3331_p3, %p3330_p2 }
  0x29   :  { %p3333_p5 = pnand %p3332_p4, %p3326_p1 }
  0x2b   :  { %3336 = shalt.err (!%p3333_p5)
}
  0x2c   :  { %s3433_s4 = smov 256   ;;  %s3434_s26 = smov 16  }
  0x2d   :  { %54 = dma.hbm_to_vmem [thread:$0]  %s3598_s3, 36864, %s49_s22, [#allocation6], %s3433_s4, %s3433_s4, %s3434_s26  }
  0x2e   :  { %s3435_s29 = smov [#allocation10]  }
  0x2f   :  { %s70_s30 = sshll.u32 %s3435_s29, 4  ;;  %s71_s30 = int_to_ptr.vmem [resolvable:$true] %s70_s30 }
  0x30   :  { %s3345_s10 = scalar_lea.vmem %s71_s30, 1024  ;;  %p3350_p7 = scmp.lt.s32.totalorder %s71_s30, %s71_s30 }
  0x31   :  { %p3346_p6 = scmp.ne.s32.totalorder %s71_s30, %s3345_s10  ;;  %p3351_p8 = scmp.lt.s32.totalorder %s3345_s10, %s3345_s10 }
  0x33   :  { %p3352_p9 = por %p3351_p8, %p3350_p7 }
  0x35   :  { %p3353_p10 = pnand %p3352_p9, %p3346_p6 }
  0x37   :  { %3356 = shalt.err (!%p3353_p10)
}
  0x38   :  { %s3436_s1 = smov 64   ;;  %s3437_s11 = smov 4  }
  0x39   :  { %76 = dma.hbm_to_vmem [thread:$0]  %s3600_s5, 1024, %s71_s30, [#allocation9], %s3436_s1, %s3436_s1, %s3437_s11  }
  0x3a   :  { %s3438_s14 = smov [#allocation11]  }
  0x3b   :  { %s83_s15 = sshll.u32 %s3438_s14, 4  ;;  %s84_s15 = int_to_ptr.vmem [resolvable:$true] %s83_s15 }
  0x3c   :  { %s3365_s3 = scalar_lea.vmem %s84_s15, 16  ;;  %s3369_s16 = scalar_lea.vmem %s84_s15, 32 }
  0x3d   :  { %p3366_p11 = scmp.ne.s32.totalorder %s84_s15, %s3365_s3  ;;  %p3370_p12 = scmp.lt.s32.totalorder %s84_s15, %s84_s15 }
  0x3e   :  { %p3371_p13 = scmp.lt.s32.totalorder %s3369_s16, %s3365_s3 }
  0x40   :  { %p3372_p0 = por %p3371_p13, %p3370_p12 }
  0x42   :  { %p3373_p1 = pnand %p3372_p0, %p3366_p11 }
  0x44   :  { %3376 = shalt.err (!%p3373_p1)
}
  0x45   :  { %86 = dma.hbm_to_vmem [thread:$0]  %s3601_s6, 16, %s84_s15, [#allocation12]  }
  0x46   :  { %3417 = dma.done.wait [#allocation3], 128  }
  0x47   :  { %3418 = vsyncadd [#allocation3], 4294967168 }
  0x48   :  { %3419 = dma.done.wait [#allocation6], 36992  }
  0x49   :  { %3420 = vsyncadd [#allocation6], 4294930304 }
  0x4a   :  { %3421 = dma.done.wait [#allocation9], 1088  }
  0x4b   :  { %3422 = vsyncadd [#allocation9], 4294966208 }
  0x4c   :  { %3423 = dma.done.wait [#allocation12], 16  }
  0x4d   :  { %3424 = vsyncadd [#allocation12], 4294967280  ;;  %v2801_v0 = vld [vmem:[#allocation7 + $0xe4] ss:$16 sps:$4 sm:$0xff]   ;;  %v2805_v2 = vld [vmem:[#allocation7 + $0xe0] ss:$16 sps:$4 sm:$0xff]  }
  0x4e   :  { %v2803_v1 = vld [vmem:[#allocation7 + $0x2e4] ss:$16 sps:$4 sm:$0xff]   ;;  %1874 = vmatprep.subr.bf16.mxu0 %v2801_v0  ;;  %v2806_v3 = vld [vmem:[#allocation7 + $0x2e0] ss:$16 sps:$4 sm:$0xff]   ;;  %v107_v46 = vld [vmem:[%s3595_s0 + $0x8] sm:$0xff]  ;;  %vm3441_vm0 = vmmov 0  }
  0x4f   :  { %1915 = vmatprep.subr.bf16.mxu1 %v2803_v1  ;;  %v2807_v4 = vld [vmem:[#allocation7 + $0xc4] ss:$16 sps:$4 sm:$0xff]   ;;  %1875 = vmatpush1.bf16.msra.mxu0 %v2805_v2  ;;  %v2811_v6 = vld [vmem:[#allocation7 + $0xc0] ss:$16 sps:$4 sm:$0xff]   ;;  %v3515_v49 = vpack.c.bf16 %v107_v46, %v107_v46  ;;  %v109_v50 = vld [vmem:[%s3595_s0 + $0x18] sm:$0xff]  ;;  %s3443_s1 = smov [#allocation14]  }
  0x50   :  { %1916 = vmatpush1.bf16.msra.mxu1 %v2806_v3  ;;  %v2809_v5 = vld [vmem:[#allocation7 + $0x2c4] ss:$16 sps:$4 sm:$0xff]   ;;  %1876 = vmatprep.subr.bf16.mxu0 %v2807_v4  ;;  %v2812_v7 = vld [vmem:[#allocation7 + $0x2c0] ss:$16 sps:$4 sm:$0xff]   ;;  %v3520_v52 = vpack.c.bf16 %v109_v50, %v109_v50  ;;  %s2442_s11 = sshll.u32 %s3443_s1, 4  ;;  %s2443_s11 = int_to_ptr.vmem [resolvable:$true] %s2442_s11 }
  0x51   :  { %1917 = vmatprep.subr.bf16.mxu1 %v2809_v5  ;;  %v2813_v8 = vld [vmem:[#allocation7 + $0xa4] ss:$16 sps:$4 sm:$0xff]   ;;  %v2817_v10 = vld [vmem:[#allocation7 + $0xa0] ss:$16 sps:$4 sm:$0xff]   ;;  %1906 = vmatprep.mubr.bf16.mxu0 %v3515_v49 }
  0x52   :  { %v2815_v9 = vld [vmem:[#allocation7 + $0x2a4] ss:$16 sps:$4 sm:$0xff]   ;;  %v2818_v11 = vld [vmem:[#allocation7 + $0x2a0] ss:$16 sps:$4 sm:$0xff]   ;;  %1947 = vmatprep.mubr.bf16.mxu1 %v3520_v52 }
  0x53   :  { %1877 = vmatpush1.bf16.msra.mxu0 %v2811_v6  ;;  %v2819_v12 = vld [vmem:[#allocation7 + $0x84] ss:$16 sps:$4 sm:$0xff]   ;;  %v2823_v14 = vld [vmem:[#allocation7 + $0x80] ss:$16 sps:$4 sm:$0xff]  }
  0x54   :  { %1918 = vmatpush1.bf16.msra.mxu1 %v2812_v7  ;;  %1878 = vmatprep.subr.bf16.mxu0 %v2813_v8  ;;  %v2821_v13 = vld [vmem:[#allocation7 + $0x284] ss:$16 sps:$4 sm:$0xff]   ;;  %v2824_v15 = vld [vmem:[#allocation7 + $0x280] ss:$16 sps:$4 sm:$0xff]  }
  0x55   :  { %1919 = vmatprep.subr.bf16.mxu1 %v2815_v9  ;;  %v2825_v16 = vld [vmem:[#allocation7 + $0x64] ss:$16 sps:$4 sm:$0xff]   ;;  %v2829_v18 = vld [vmem:[#allocation7 + $0x60] ss:$16 sps:$4 sm:$0xff]  }
  0x56   :  { %v2827_v17 = vld [vmem:[#allocation7 + $0x264] ss:$16 sps:$4 sm:$0xff]   ;;  %v2830_v19 = vld [vmem:[#allocation7 + $0x260] ss:$16 sps:$4 sm:$0xff]  }
  0x57   :  { %1879 = vmatpush1.bf16.msra.mxu0 %v2817_v10  ;;  %v2831_v20 = vld [vmem:[#allocation7 + $0x44] ss:$16 sps:$4 sm:$0xff]   ;;  %v2835_v22 = vld [vmem:[#allocation7 + $0x40] ss:$16 sps:$4 sm:$0xff]  }
  0x58   :  { %1920 = vmatpush1.bf16.msra.mxu1 %v2818_v11  ;;  %1880 = vmatprep.subr.bf16.mxu0 %v2819_v12  ;;  %v2833_v21 = vld [vmem:[#allocation7 + $0x244] ss:$16 sps:$4 sm:$0xff]   ;;  %v2836_v23 = vld [vmem:[#allocation7 + $0x240] ss:$16 sps:$4 sm:$0xff]  }
  0x59   :  { %1921 = vmatprep.subr.bf16.mxu1 %v2821_v13  ;;  %v2837_v24 = vld [vmem:[#allocation7 + $0x24] ss:$16 sps:$4 sm:$0xff]   ;;  %v2841_v26 = vld [vmem:[#allocation7 + $0x20] ss:$16 sps:$4 sm:$0xff]  }
  0x5a   :  { %v2839_v25 = vld [vmem:[#allocation7 + $0x224] ss:$16 sps:$4 sm:$0xff]   ;;  %v2842_v27 = vld [vmem:[#allocation7 + $0x220] ss:$16 sps:$4 sm:$0xff]  }
  0x5b   :  { %1881 = vmatpush1.bf16.msra.mxu0 %v2823_v14  ;;  %v2843_v28 = vld [vmem:[#allocation7 + $0x4] ss:$16 sps:$4 sm:$0xff]   ;;  %v2847_v30 = vld [vmem:[#allocation7] ss:$16 sps:$4 sm:$0xff]  }
  0x5c   :  { %1922 = vmatpush1.bf16.msra.mxu1 %v2824_v15  ;;  %1882 = vmatprep.subr.bf16.mxu0 %v2825_v16  ;;  %v2845_v29 = vld [vmem:[#allocation7 + $0x204] ss:$16 sps:$4 sm:$0xff]   ;;  %v2848_v31 = vld [vmem:[#allocation7 + $0x200] ss:$16 sps:$4 sm:$0xff]  }
  0x5d   :  { %1923 = vmatprep.subr.bf16.mxu1 %v2827_v17  ;;  %v2849_v32 = vld [vmem:[#allocation7 + $0x1e4] ss:$16 sps:$4 sm:$0xff]   ;;  %v2853_v34 = vld [vmem:[#allocation7 + $0x1e0] ss:$16 sps:$4 sm:$0xff]  }
  0x5e   :  { %v2851_v33 = vld [vmem:[#allocation7 + $0x3e4] ss:$16 sps:$4 sm:$0xff]   ;;  %v2854_v35 = vld [vmem:[#allocation7 + $0x3e0] ss:$16 sps:$4 sm:$0xff]  }
  0x5f   :  { %1883 = vmatpush1.bf16.msra.mxu0 %v2829_v18  ;;  %v2855_v36 = vld [vmem:[#allocation7 + $0x1c4] ss:$16 sps:$4 sm:$0xff]   ;;  %v2859_v38 = vld [vmem:[#allocation7 + $0x1c0] ss:$16 sps:$4 sm:$0xff]  }
  0x60   :  { %1924 = vmatpush1.bf16.msra.mxu1 %v2830_v19  ;;  %1884 = vmatprep.subr.bf16.mxu0 %v2831_v20  ;;  %v2857_v37 = vld [vmem:[#allocation7 + $0x3c4] ss:$16 sps:$4 sm:$0xff]   ;;  %v2860_v39 = vld [vmem:[#allocation7 + $0x3c0] ss:$16 sps:$4 sm:$0xff]  }
  0x61   :  { %1925 = vmatprep.subr.bf16.mxu1 %v2833_v21  ;;  %v2861_v40 = vld [vmem:[#allocation7 + $0x1a4] ss:$16 sps:$4 sm:$0xff]   ;;  %v2865_v42 = vld [vmem:[#allocation7 + $0x1a0] ss:$16 sps:$4 sm:$0xff]  }
  0x62   :  { %v2863_v41 = vld [vmem:[#allocation7 + $0x3a4] ss:$16 sps:$4 sm:$0xff]   ;;  %v2866_v43 = vld [vmem:[#allocation7 + $0x3a0] ss:$16 sps:$4 sm:$0xff]  }
  0x63   :  { %1885 = vmatpush1.bf16.msra.mxu0 %v2835_v22  ;;  %v2867_v44 = vld [vmem:[#allocation7 + $0x184] ss:$16 sps:$4 sm:$0xff]   ;;  %v2871_v47 = vld [vmem:[#allocation7 + $0x180] ss:$16 sps:$4 sm:$0xff]  }
  0x64   :  { %1926 = vmatpush1.bf16.msra.mxu1 %v2836_v23  ;;  %1886 = vmatprep.subr.bf16.mxu0 %v2837_v24  ;;  %v2869_v45 = vld [vmem:[#allocation7 + $0x384] ss:$16 sps:$4 sm:$0xff]   ;;  %v2872_v48 = vld [vmem:[#allocation7 + $0x380] ss:$16 sps:$4 sm:$0xff]  }
  0x65   :  { %1927 = vmatprep.subr.bf16.mxu1 %v2839_v25  ;;  %v2873_v51 = vld [vmem:[#allocation7 + $0x164] ss:$16 sps:$4 sm:$0xff]   ;;  %v2877_v54 = vld [vmem:[#allocation7 + $0x160] ss:$16 sps:$4 sm:$0xff]  }
  0x66   :  { %v2875_v53 = vld [vmem:[#allocation7 + $0x364] ss:$16 sps:$4 sm:$0xff]   ;;  %v2878_v55 = vld [vmem:[#allocation7 + $0x360] ss:$16 sps:$4 sm:$0xff]  }
  0x67   :  { %1887 = vmatpush1.bf16.msra.mxu0 %v2841_v26  ;;  %v2879_v56 = vld [vmem:[#allocation7 + $0x144] ss:$16 sps:$4 sm:$0xff]   ;;  %v2883_v58 = vld [vmem:[#allocation7 + $0x140] ss:$16 sps:$4 sm:$0xff]  }
  0x68   :  { %1928 = vmatpush1.bf16.msra.mxu1 %v2842_v27  ;;  %1888 = vmatprep.subr.bf16.mxu0 %v2843_v28  ;;  %v2881_v57 = vld [vmem:[#allocation7 + $0x344] ss:$16 sps:$4 sm:$0xff]   ;;  %v2884_v59 = vld [vmem:[#allocation7 + $0x340] ss:$16 sps:$4 sm:$0xff]  }
  0x69   :  { %1929 = vmatprep.subr.bf16.mxu1 %v2845_v29  ;;  %v2885_v60 = vld [vmem:[#allocation7 + $0x124] ss:$16 sps:$4 sm:$0xff]   ;;  %v2889_v62 = vld [vmem:[#allocation7 + $0x120] ss:$16 sps:$4 sm:$0xff]  }
  0x6a   :  { %v2887_v61 = vld [vmem:[#allocation7 + $0x324] ss:$16 sps:$4 sm:$0xff]   ;;  %v2890_v63 = vld [vmem:[#allocation7 + $0x320] ss:$16 sps:$4 sm:$0xff]  }
  0x6b   :  { %1889 = vmatpush1.bf16.msra.mxu0 %v2847_v30  ;;  %v2891_v0 = vld [vmem:[#allocation7 + $0x104] ss:$16 sps:$4 sm:$0xff]   ;;  %v2895_v2 = vld [vmem:[#allocation7 + $0x100] ss:$16 sps:$4 sm:$0xff]  }
  0x6c   :  { %1930 = vmatpush1.bf16.msra.mxu1 %v2848_v31  ;;  %1890 = vmatprep.subr.bf16.mxu0 %v2849_v32  ;;  %v2893_v1 = vld [vmem:[#allocation7 + $0x304] ss:$16 sps:$4 sm:$0xff]   ;;  %v2896_v3 = vld [vmem:[#allocation7 + $0x300] ss:$16 sps:$4 sm:$0xff]  }
  0x6d   :  { %1931 = vmatprep.subr.bf16.mxu1 %v2851_v33  ;;  %v106_v4 = vld [vmem:[%s3595_s0] sm:$0xff]  ;;  %v108_v5 = vld [vmem:[%s3595_s0 + $0x10] sm:$0xff] }
  0x6e   :  { %v2899_v6 = vld [vmem:[#allocation7 + $0x4e4] ss:$16 sps:$4 sm:$0xff]   ;;  %v3530_v8 = vpack.c.bf16 %v106_v4, %v106_v4  ;;  %v3532_v9 = vpack.c.bf16 %v108_v5, %v108_v5  ;;  %v2897_v10 = vld [vmem:[#allocation7 + $0x4e0] ss:$16 sps:$4 sm:$0xff]  }
  0x6f   :  { %1891 = vmatpush2.bf16.msra.mxu0 %v2853_v34  ;;  %v2902_v7 = vld [vmem:[#allocation7 + $0x6e4] ss:$16 sps:$4 sm:$0xff]   ;;  %v2900_v11 = vld [vmem:[#allocation7 + $0x6e0] ss:$16 sps:$4 sm:$0xff]   ;;  %v111_v34 = vld [vmem:[%s3595_s0 + $0x28] sm:$0xff] }
  0x70   :  { %1932 = vmatpush2.bf16.msra.mxu1 %v2854_v35  ;;  %1892 = vmatprep.subr.bf16.mxu0 %v2855_v36  ;;  %v2905_v12 = vld [vmem:[#allocation7 + $0x4c4] ss:$16 sps:$4 sm:$0xff]   ;;  %v2903_v14 = vld [vmem:[#allocation7 + $0x4c0] ss:$16 sps:$4 sm:$0xff]  }
  0x71   :  { %1933 = vmatprep.subr.bf16.mxu1 %v2857_v37  ;;  %v2908_v13 = vld [vmem:[#allocation7 + $0x6c4] ss:$16 sps:$4 sm:$0xff]   ;;  %v2906_v15 = vld [vmem:[#allocation7 + $0x6c0] ss:$16 sps:$4 sm:$0xff]   ;;  %v3539_v37 = vpack.c.bf16 %v111_v34, %v111_v34  ;;  %v3016_v34 = vld [vmem:[#allocation7 + $0x8c] ss:$16 sps:$4 sm:$0xff]  }
  0x72   :  { %v2911_v16 = vld [vmem:[#allocation7 + $0x4a4] ss:$16 sps:$4 sm:$0xff]   ;;  %v2909_v18 = vld [vmem:[#allocation7 + $0x4a0] ss:$16 sps:$4 sm:$0xff]  }
  0x73   :  { %1893 = vmatpush2.bf16.msra.mxu0 %v2859_v38  ;;  %v2914_v17 = vld [vmem:[#allocation7 + $0x6a4] ss:$16 sps:$4 sm:$0xff]   ;;  %v2912_v19 = vld [vmem:[#allocation7 + $0x6a0] ss:$16 sps:$4 sm:$0xff]   ;;  %v113_v38 = vld [vmem:[%s3595_s0 + $0x38] sm:$0xff] }
  0x74   :  { %1934 = vmatpush2.bf16.msra.mxu1 %v2860_v39  ;;  %1894 = vmatprep.subr.bf16.mxu0 %v2861_v40  ;;  %v2917_v20 = vld [vmem:[#allocation7 + $0x484] ss:$16 sps:$4 sm:$0xff]   ;;  %v2915_v22 = vld [vmem:[#allocation7 + $0x480] ss:$16 sps:$4 sm:$0xff]   ;;  %v3544_v40 = vpack.c.bf16 %v113_v38, %v113_v38 }
  0x75   :  { %1935 = vmatprep.subr.bf16.mxu1 %v2863_v41  ;;  %v2920_v21 = vld [vmem:[#allocation7 + $0x684] ss:$16 sps:$4 sm:$0xff]   ;;  %v2918_v23 = vld [vmem:[#allocation7 + $0x680] ss:$16 sps:$4 sm:$0xff]  }
  0x76   :  { %v2923_v24 = vld [vmem:[#allocation7 + $0x464] ss:$16 sps:$4 sm:$0xff]   ;;  %v2921_v26 = vld [vmem:[#allocation7 + $0x460] ss:$16 sps:$4 sm:$0xff]  }
  0x77   :  { %1895 = vmatpush2.bf16.msra.mxu0 %v2865_v42  ;;  %v2926_v25 = vld [vmem:[#allocation7 + $0x664] ss:$16 sps:$4 sm:$0xff]   ;;  %v2924_v27 = vld [vmem:[#allocation7 + $0x660] ss:$16 sps:$4 sm:$0xff]  }
  0x78   :  { %1936 = vmatpush2.bf16.msra.mxu1 %v2866_v43  ;;  %1896 = vmatprep.subr.bf16.mxu0 %v2867_v44  ;;  %v2929_v28 = vld [vmem:[#allocation7 + $0x444] ss:$16 sps:$4 sm:$0xff]   ;;  %v2927_v30 = vld [vmem:[#allocation7 + $0x440] ss:$16 sps:$4 sm:$0xff]  }
  0x79   :  { %1937 = vmatprep.subr.bf16.mxu1 %v2869_v45  ;;  %v2932_v29 = vld [vmem:[#allocation7 + $0x644] ss:$16 sps:$4 sm:$0xff]   ;;  %v2930_v31 = vld [vmem:[#allocation7 + $0x640] ss:$16 sps:$4 sm:$0xff]  }
  0x7a   :  { %v2935_v32 = vld [vmem:[#allocation7 + $0x424] ss:$16 sps:$4 sm:$0xff]   ;;  %v2933_v35 = vld [vmem:[#allocation7 + $0x420] ss:$16 sps:$4 sm:$0xff]  }
  0x7b   :  { %1897 = vmatpush2.bf16.msra.mxu0 %v2871_v47  ;;  %v2938_v33 = vld [vmem:[#allocation7 + $0x624] ss:$16 sps:$4 sm:$0xff]   ;;  %v2936_v36 = vld [vmem:[#allocation7 + $0x620] ss:$16 sps:$4 sm:$0xff]  }
  0x7c   :  { %1938 = vmatpush2.bf16.msra.mxu1 %v2872_v48  ;;  %1898 = vmatprep.subr.bf16.mxu0 %v2873_v51  ;;  %v2941_v39 = vld [vmem:[#allocation7 + $0x404] ss:$16 sps:$4 sm:$0xff]   ;;  %v2939_v42 = vld [vmem:[#allocation7 + $0x400] ss:$16 sps:$4 sm:$0xff]  }
  0x7d   :  { %1939 = vmatprep.subr.bf16.mxu1 %v2875_v53  ;;  %v2944_v41 = vld [vmem:[#allocation7 + $0x604] ss:$16 sps:$4 sm:$0xff]   ;;  %v2942_v43 = vld [vmem:[#allocation7 + $0x600] ss:$16 sps:$4 sm:$0xff]  }
  0x7e   :  { %v2947_v44 = vld [vmem:[#allocation7 + $0x5e4] ss:$16 sps:$4 sm:$0xff]   ;;  %v2945_v46 = vld [vmem:[#allocation7 + $0x5e0] ss:$16 sps:$4 sm:$0xff]  }
  0x7f   :  { %1899 = vmatpush2.bf16.msra.mxu0 %v2877_v54  ;;  %v2950_v45 = vld [vmem:[#allocation7 + $0x7e4] ss:$16 sps:$4 sm:$0xff]   ;;  %v2948_v47 = vld [vmem:[#allocation7 + $0x7e0] ss:$16 sps:$4 sm:$0xff]  }
  0x80   :  { %1940 = vmatpush2.bf16.msra.mxu1 %v2878_v55  ;;  %1900 = vmatprep.subr.bf16.mxu0 %v2879_v56  ;;  %v2953_v48 = vld [vmem:[#allocation7 + $0x5c4] ss:$16 sps:$4 sm:$0xff]   ;;  %v2951_v51 = vld [vmem:[#allocation7 + $0x5c0] ss:$16 sps:$4 sm:$0xff]  }
  0x81   :  { %1941 = vmatprep.subr.bf16.mxu1 %v2881_v57  ;;  %v2956_v50 = vld [vmem:[#allocation7 + $0x7c4] ss:$16 sps:$4 sm:$0xff]   ;;  %v2954_v53 = vld [vmem:[#allocation7 + $0x7c0] ss:$16 sps:$4 sm:$0xff]  }
  0x82   :  { %v2959_v54 = vld [vmem:[#allocation7 + $0x5a4] ss:$16 sps:$4 sm:$0xff]   ;;  %v2957_v56 = vld [vmem:[#allocation7 + $0x5a0] ss:$16 sps:$4 sm:$0xff]  }
  0x83   :  { %1901 = vmatpush2.bf16.msra.mxu0 %v2883_v58  ;;  %v2962_v55 = vld [vmem:[#allocation7 + $0x7a4] ss:$16 sps:$4 sm:$0xff]   ;;  %v2960_v57 = vld [vmem:[#allocation7 + $0x7a0] ss:$16 sps:$4 sm:$0xff]  }
  0x84   :  { %1942 = vmatpush2.bf16.msra.mxu1 %v2884_v59  ;;  %1902 = vmatprep.subr.bf16.mxu0 %v2885_v60  ;;  %v2965_v58 = vld [vmem:[#allocation7 + $0x584] ss:$16 sps:$4 sm:$0xff]   ;;  %v2963_v60 = vld [vmem:[#allocation7 + $0x580] ss:$16 sps:$4 sm:$0xff]  }
  0x85   :  { %1943 = vmatprep.subr.bf16.mxu1 %v2887_v61  ;;  %v2968_v59 = vld [vmem:[#allocation7 + $0x784] ss:$16 sps:$4 sm:$0xff]   ;;  %v2966_v61 = vld [vmem:[#allocation7 + $0x780] ss:$16 sps:$4 sm:$0xff]  }
  0x86   :  { %v2975_v4 = vld [vmem:[#allocation7 + $0x540] ss:$16 sps:$4 sm:$0xff]   ;;  %v3019_v38 = vld [vmem:[#allocation7 + $0x864] ss:$16 sps:$4 sm:$0xff]  }
  0x87   :  { %1903 = vmatpush2.bf16.msra.mxu0 %v2889_v62  ;;  %v2971_v62 = vld [vmem:[#allocation7 + $0x564] ss:$16 sps:$4 sm:$0xff]   ;;  %v2978_v5 = vld [vmem:[#allocation7 + $0x740] ss:$16 sps:$4 sm:$0xff]  }
  0x88   :  { %1944 = vmatpush2.bf16.msra.mxu1 %v2890_v63  ;;  %1904 = vmatprep.subr.bf16.mxu0 %v2891_v0  ;;  %v2974_v63 = vld [vmem:[#allocation7 + $0x764] ss:$16 sps:$4 sm:$0xff]   ;;  %v2969_v0 = vld [vmem:[#allocation7 + $0x560] ss:$16 sps:$4 sm:$0xff]  }
  0x89   :  { %1945 = vmatprep.subr.bf16.mxu1 %v2893_v1  ;;  %v2972_v1 = vld [vmem:[#allocation7 + $0x760] ss:$16 sps:$4 sm:$0xff]  }
  0x8b   :  { %1905 = vmatpush2.bf16.msra.mxu0 %v2895_v2  ;;  %v2977_v2 = vld [vmem:[#allocation7 + $0x544] ss:$16 sps:$4 sm:$0xff]  }
  0x8c   :  { %1946 = vmatpush2.bf16.msra.mxu1 %v2896_v3  ;;  %1956 = vmatprep.subr.bf16.mxu0 %v2899_v6  ;;  %v2980_v3 = vld [vmem:[#allocation7 + $0x744] ss:$16 sps:$4 sm:$0xff]  }
  0x8d   :  { %1997 = vmatprep.subr.bf16.mxu1 %v2902_v7  ;;  %v2983_v6 = vld [vmem:[#allocation7 + $0x524] ss:$16 sps:$4 sm:$0xff]  }
  0x8e   :  { %1907 = vmatmul.mubr.bf16.vlgmr.msra.gmra.mxu0 %v3530_v8  ;;  %v2986_v7 = vld [vmem:[#allocation7 + $0x724] ss:$16 sps:$4 sm:$0xff]  }
  0x8f   :  { %1948 = vmatmul.mubr.bf16.vlgmr.msra.gmra.mxu1 %v3532_v9  ;;  %1957 = vmatpush1.bf16.msra.mxu0 %v2897_v10  ;;  %v2981_v10 = vld [vmem:[#allocation7 + $0x520] ss:$16 sps:$4 sm:$0xff]  }
  0x90   :  { %1998 = vmatpush1.bf16.msra.mxu1 %v2900_v11  ;;  %1958 = vmatprep.subr.bf16.mxu0 %v2905_v12  ;;  %v2984_v11 = vld [vmem:[#allocation7 + $0x720] ss:$16 sps:$4 sm:$0xff]   ;;  %v2989_v12 = vld [vmem:[#allocation7 + $0x504] ss:$16 sps:$4 sm:$0xff]  }
  0x91   :  { %1999 = vmatprep.subr.bf16.mxu1 %v2908_v13  ;;  %1988 = vmatprep.mubr.bf16.mxu0 %v3539_v37  ;;  %v2992_v13 = vld [vmem:[#allocation7 + $0x704] ss:$16 sps:$4 sm:$0xff]  }
  0x92   :  { %2029 = vmatprep.mubr.bf16.mxu1 %v3544_v40 }
  0x93   :  { %1959 = vmatpush1.bf16.msra.mxu0 %v2903_v14  ;;  %v2987_v14 = vld [vmem:[#allocation7 + $0x500] ss:$16 sps:$4 sm:$0xff]  }
  0x94   :  { %2000 = vmatpush1.bf16.msra.mxu1 %v2906_v15  ;;  %1960 = vmatprep.subr.bf16.mxu0 %v2911_v16  ;;  %v2990_v15 = vld [vmem:[#allocation7 + $0x700] ss:$16 sps:$4 sm:$0xff]  }
  0x95   :  { %2001 = vmatprep.subr.bf16.mxu1 %v2914_v17  ;;  %v110_v16 = vld [vmem:[%s3595_s0 + $0x20] sm:$0xff]  ;;  %v112_v17 = vld [vmem:[%s3595_s0 + $0x30] sm:$0xff]  ;;  %s3442_s0 = smov [#allocation13]  }
  0x96   :  { %s2432_s10 = sshll.u32 %s3442_s0, 4  ;;  %s2433_s10 = int_to_ptr.vmem [resolvable:$true] %s2432_s10 }
  0x97   :  { %1961 = vmatpush1.bf16.msra.mxu0 %v2909_v18  ;;  %v2995_v18 = vld [vmem:[#allocation7 + $0x8e4] ss:$16 sps:$4 sm:$0xff]   ;;  %s3377_s12 = scalar_lea.vmem %s2433_s10, 128  ;;  %p3382_p3 = scmp.lt.s32.totalorder %s2433_s10, %s2433_s10 }
  0x98   :  { %2002 = vmatpush1.bf16.msra.mxu1 %v2912_v19  ;;  %1962 = vmatprep.subr.bf16.mxu0 %v2917_v20  ;;  %v2998_v19 = vld [vmem:[#allocation7 + $0xec] ss:$16 sps:$4 sm:$0xff]   ;;  %v3554_v20 = vpack.c.bf16 %v110_v16, %v110_v16  ;;  %p3378_p2 = scmp.ne.s32.totalorder %s2433_s10, %s3377_s12  ;;  %p3383_p4 = scmp.lt.s32.totalorder %s3377_s12, %s3377_s12 }
  0x99   :  { %2003 = vmatprep.subr.bf16.mxu1 %v2920_v21  ;;  %v3556_v21 = vpack.c.bf16 %v112_v17, %v112_v17  ;;  %v3076_v16 = vld [vmem:[#allocation7 + $0x24c] ss:$16 sps:$4 sm:$0xff]   ;;  %v3071_v17 = vld [vmem:[#allocation7 + $0x148] ss:$16 sps:$4 sm:$0xff]  }
  0x9a   :  { %p3384_p5 = por %p3383_p4, %p3382_p3 }
  0x9b   :  { %1963 = vmatpush1.bf16.msra.mxu0 %v2915_v22  ;;  %v2993_v22 = vld [vmem:[#allocation7 + $0x8e0] ss:$16 sps:$4 sm:$0xff]  }
  0x9c   :  { %2004 = vmatpush1.bf16.msra.mxu1 %v2918_v23  ;;  %1964 = vmatprep.subr.bf16.mxu0 %v2923_v24  ;;  %v2996_v23 = vld [vmem:[#allocation7 + $0xe8] ss:$16 sps:$4 sm:$0xff]   ;;  %v3001_v24 = vld [vmem:[#allocation7 + $0x8c4] ss:$16 sps:$4 sm:$0xff]   ;;  %p3385_p6 = pnand %p3384_p5, %p3378_p2 }
  0x9d   :  { %2005 = vmatprep.subr.bf16.mxu1 %v2926_v25  ;;  %v3004_v25 = vld [vmem:[#allocation7 + $0xcc] ss:$16 sps:$4 sm:$0xff]  }
  0x9f   :  { %1965 = vmatpush1.bf16.msra.mxu0 %v2921_v26  ;;  %v2999_v26 = vld [vmem:[#allocation7 + $0x8c0] ss:$16 sps:$4 sm:$0xff]  }
  0xa0   :  { %2006 = vmatpush1.bf16.msra.mxu1 %v2924_v27  ;;  %1966 = vmatprep.subr.bf16.mxu0 %v2929_v28  ;;  %v3002_v27 = vld [vmem:[#allocation7 + $0xc8] ss:$16 sps:$4 sm:$0xff]   ;;  %v3007_v28 = vld [vmem:[#allocation7 + $0x8a4] ss:$16 sps:$4 sm:$0xff]  }
  0xa1   :  { %2007 = vmatprep.subr.bf16.mxu1 %v2932_v29  ;;  %v3010_v29 = vld [vmem:[#allocation7 + $0xac] ss:$16 sps:$4 sm:$0xff]  }
  0xa3   :  { %1967 = vmatpush1.bf16.msra.mxu0 %v2927_v30  ;;  %v3439_v30 = vmov 0  }
  0xa4   :  { %2008 = vmatpush1.bf16.msra.mxu1 %v2930_v31  ;;  %1968 = vmatprep.subr.bf16.mxu0 %v2935_v32  ;;  %v3005_v31 = vld [vmem:[#allocation7 + $0x8a0] ss:$16 sps:$4 sm:$0xff]   ;;  %v3008_v32 = vld [vmem:[#allocation7 + $0xa8] ss:$16 sps:$4 sm:$0xff]  }
  0xa5   :  { %2009 = vmatprep.subr.bf16.mxu1 %v2938_v33  ;;  %v3013_v33 = vld [vmem:[#allocation7 + $0x884] ss:$16 sps:$4 sm:$0xff]  }
  0xa7   :  { %1969 = vmatpush1.bf16.msra.mxu0 %v2933_v35  ;;  %v3011_v35 = vld [vmem:[#allocation7 + $0x880] ss:$16 sps:$4 sm:$0xff]  }
  0xa8   :  { %2010 = vmatpush1.bf16.msra.mxu1 %v2936_v36  ;;  %1970 = vmatprep.subr.bf16.mxu0 %v2941_v39  ;;  %v3014_v36 = vld [vmem:[#allocation7 + $0x88] ss:$16 sps:$4 sm:$0xff]   ;;  %v3022_v39 = vld [vmem:[#allocation7 + $0x6c] ss:$16 sps:$4 sm:$0xff]  }
  0xa9   :  { %2011 = vmatprep.subr.bf16.mxu1 %v2944_v41  ;;  %v3017_v41 = vld [vmem:[#allocation7 + $0x860] ss:$16 sps:$4 sm:$0xff]  }
  0xab   :  { %1971 = vmatpush1.bf16.msra.mxu0 %v2939_v42  ;;  %v3025_v42 = vld [vmem:[#allocation7 + $0x844] ss:$16 sps:$4 sm:$0xff]  }
  0xac   :  { %2012 = vmatpush1.bf16.msra.mxu1 %v2942_v43  ;;  %1972 = vmatprep.subr.bf16.mxu0 %v2947_v44  ;;  %v3028_v43 = vld [vmem:[#allocation7 + $0x4c] ss:$16 sps:$4 sm:$0xff]   ;;  %v3023_v44 = vld [vmem:[#allocation7 + $0x840] ss:$16 sps:$4 sm:$0xff]  }
  0xad   :  { %2013 = vmatprep.subr.bf16.mxu1 %v2950_v45  ;;  %v3026_v45 = vld [vmem:[#allocation7 + $0x48] ss:$16 sps:$4 sm:$0xff]  }
  0xaf   :  { %1973 = vmatpush2.bf16.msra.mxu0 %v2945_v46  ;;  %v3031_v46 = vld [vmem:[#allocation7 + $0x824] ss:$16 sps:$4 sm:$0xff]  }
  0xb0   :  { %2014 = vmatpush2.bf16.msra.mxu1 %v2948_v47  ;;  %1974 = vmatprep.subr.bf16.mxu0 %v2953_v48  ;;  %v3034_v47 = vld [vmem:[#allocation7 + $0x2c] ss:$16 sps:$4 sm:$0xff]   ;;  %v3029_v48 = vld [vmem:[#allocation7 + $0x820] ss:$16 sps:$4 sm:$0xff]  }
  0xb1   :  { %2015 = vmatprep.subr.bf16.mxu1 %v2956_v50  ;;  %v3032_v50 = vld [vmem:[#allocation7 + $0x28] ss:$16 sps:$4 sm:$0xff]  }
  0xb3   :  { %1975 = vmatpush2.bf16.msra.mxu0 %v2951_v51  ;;  %v3037_v51 = vld [vmem:[#allocation7 + $0x804] ss:$16 sps:$4 sm:$0xff]  }
  0xb4   :  { %2016 = vmatpush2.bf16.msra.mxu1 %v2954_v53  ;;  %1976 = vmatprep.subr.bf16.mxu0 %v2959_v54  ;;  %v3040_v53 = vld [vmem:[#allocation7 + $0xc] ss:$16 sps:$4 sm:$0xff]   ;;  %v3035_v54 = vld [vmem:[#allocation7 + $0x800] ss:$16 sps:$4 sm:$0xff]  }
  0xb5   :  { %2017 = vmatprep.subr.bf16.mxu1 %v2962_v55  ;;  %v3038_v55 = vld [vmem:[#allocation7 + $0x8] ss:$16 sps:$4 sm:$0xff]  }
  0xb7   :  { %1977 = vmatpush2.bf16.msra.mxu0 %v2957_v56  ;;  %v114_v56 = vld [vmem:[#allocation2] sm:$0xff] }
  0xb8   :  { %2018 = vmatpush2.bf16.msra.mxu1 %v2960_v57  ;;  %1978 = vmatprep.subr.bf16.mxu0 %v2965_v58  ;;  %v3043_v57 = vld [vmem:[#allocation7 + $0x1ec] ss:$16 sps:$4 sm:$0xff]  }
  0xb9   :  { %2019 = vmatprep.subr.bf16.mxu1 %v2968_v59  ;;  %v3046_v58 = vld [vmem:[#allocation7 + $0x2ec] ss:$16 sps:$4 sm:$0xff]   ;;  %v3562_v59 = vpack.c.bf16 %v114_v56, %v114_v56 }
  0xba   :  { %v3130_v56 = vld [vmem:[#allocation7 + $0x42c] ss:$16 sps:$4 sm:$0xff]  }
  0xbb   :  { %1979 = vmatpush2.bf16.msra.mxu0 %v2963_v60  ;;  %v3041_v60 = vld [vmem:[#allocation7 + $0x1e8] ss:$16 sps:$4 sm:$0xff]  }
  0xbc   :  { %2020 = vmatpush2.bf16.msra.mxu1 %v2966_v61  ;;  %1980 = vmatprep.subr.bf16.mxu0 %v2971_v62  ;;  %v3044_v61 = vld [vmem:[#allocation7 + $0x2e8] ss:$16 sps:$4 sm:$0xff]   ;;  %v3049_v62 = vld [vmem:[#allocation7 + $0x1cc] ss:$16 sps:$4 sm:$0xff]  }
  0xbd   :  { %2021 = vmatprep.subr.bf16.mxu1 %v2974_v63  ;;  %v3052_v63 = vld [vmem:[#allocation7 + $0x2cc] ss:$16 sps:$4 sm:$0xff]  }
  0xbf   :  { %1981 = vmatpush2.bf16.msra.mxu0 %v2969_v0  ;;  %v3047_v0 = vld [vmem:[#allocation7 + $0x1c8] ss:$16 sps:$4 sm:$0xff]  }
  0xc0   :  { %2022 = vmatpush2.bf16.msra.mxu1 %v2972_v1  ;;  %1982 = vmatprep.subr.bf16.mxu0 %v2977_v2  ;;  %v3050_v1 = vld [vmem:[#allocation7 + $0x2c8] ss:$16 sps:$4 sm:$0xff]   ;;  %v3055_v2 = vld [vmem:[#allocation7 + $0x1ac] ss:$16 sps:$4 sm:$0xff]  }
  0xc1   :  { %2023 = vmatprep.subr.bf16.mxu1 %v2980_v3  ;;  %v3058_v3 = vld [vmem:[#allocation7 + $0x2ac] ss:$16 sps:$4 sm:$0xff]  }
  0xc3   :  { %1983 = vmatpush2.bf16.msra.mxu0 %v2975_v4  ;;  %v3053_v4 = vld [vmem:[#allocation7 + $0x1a8] ss:$16 sps:$4 sm:$0xff]  }
  0xc4   :  { %2024 = vmatpush2.bf16.msra.mxu1 %v2978_v5  ;;  %1984 = vmatprep.subr.bf16.mxu0 %v2983_v6  ;;  %v3056_v5 = vld [vmem:[#allocation7 + $0x2a8] ss:$16 sps:$4 sm:$0xff]   ;;  %v3061_v6 = vld [vmem:[#allocation7 + $0x18c] ss:$16 sps:$4 sm:$0xff]  }
  0xc5   :  { %2025 = vmatprep.subr.bf16.mxu1 %v2986_v7  ;;  %v3064_v7 = vld [vmem:[#allocation7 + $0x28c] ss:$16 sps:$4 sm:$0xff]  }
  0xc7   :  { %1985 = vmatpush2.bf16.msra.mxu0 %v2981_v10  ;;  %v3059_v10 = vld [vmem:[#allocation7 + $0x188] ss:$16 sps:$4 sm:$0xff]  }
  0xc8   :  { %2026 = vmatpush2.bf16.msra.mxu1 %v2984_v11  ;;  %1986 = vmatprep.subr.bf16.mxu0 %v2989_v12  ;;  %v3062_v11 = vld [vmem:[#allocation7 + $0x288] ss:$16 sps:$4 sm:$0xff]   ;;  %v3067_v12 = vld [vmem:[#allocation7 + $0x16c] ss:$16 sps:$4 sm:$0xff]  }
  0xc9   :  { %2027 = vmatprep.subr.bf16.mxu1 %v2992_v13  ;;  %v3070_v13 = vld [vmem:[#allocation7 + $0x26c] ss:$16 sps:$4 sm:$0xff]  }
  0xcb   :  { %1987 = vmatpush2.bf16.msra.mxu0 %v2987_v14  ;;  %v3065_v14 = vld [vmem:[#allocation7 + $0x168] ss:$16 sps:$4 sm:$0xff]  }
  0xcc   :  { %2028 = vmatpush2.bf16.msra.mxu1 %v2990_v15  ;;  %2038 = vmatprep.subr.bf16.mxu0 %v2995_v18  ;;  %v3073_v15 = vld [vmem:[#allocation7 + $0x14c] ss:$16 sps:$4 sm:$0xff]   ;;  %v3074_v18 = vld [vmem:[#allocation7 + $0x248] ss:$16 sps:$4 sm:$0xff]  }
  0xcd   :  { %2079 = vmatprep.subr.bf16.mxu1 %v2998_v19  ;;  %v3079_v19 = vld [vmem:[#allocation7 + $0x12c] ss:$16 sps:$4 sm:$0xff]  }
  0xce   :  { %1989 = vmatmul.mubr.bf16.vlgmr.msra.gmra.mxu0 %v3554_v20 }
  0xcf   :  { %2030 = vmatmul.mubr.bf16.vlgmr.msra.gmra.mxu1 %v3556_v21  ;;  %2039 = vmatpush1.bf16.msra.mxu0 %v2993_v22  ;;  %v3082_v22 = vld [vmem:[#allocation7 + $0x22c] ss:$16 sps:$4 sm:$0xff]  }
  0xd0   :  { %2080 = vmatpush1.bf16.msra.mxu1 %v2996_v23  ;;  %2040 = vmatprep.subr.bf16.mxu0 %v3001_v24  ;;  %v3077_v23 = vld [vmem:[#allocation7 + $0x128] ss:$16 sps:$4 sm:$0xff]  }
  0xd1   :  { %2081 = vmatprep.subr.bf16.mxu1 %v3004_v25  ;;  %2070 = vmatprep.mubr.bf16.mxu0 %v3439_v30  ;;  %v3080_v24 = vld [vmem:[#allocation7 + $0x228] ss:$16 sps:$4 sm:$0xff]   ;;  %v3085_v25 = vld [vmem:[#allocation7 + $0x10c] ss:$16 sps:$4 sm:$0xff]  }
  0xd2   :  { %2111 = vmatprep.mubr.bf16.mxu1 %v3515_v49  ;;  %v3020_v49 = vld [vmem:[#allocation7 + $0x68] ss:$16 sps:$4 sm:$0xff]  }
  0xd3   :  { %2041 = vmatpush1.bf16.msra.mxu0 %v2999_v26  ;;  %v3088_v26 = vld [vmem:[#allocation7 + $0x20c] ss:$16 sps:$4 sm:$0xff]  }
  0xd4   :  { %2082 = vmatpush1.bf16.msra.mxu1 %v3002_v27  ;;  %2042 = vmatprep.subr.bf16.mxu0 %v3007_v28  ;;  %v3083_v27 = vld [vmem:[#allocation7 + $0x108] ss:$16 sps:$4 sm:$0xff]  }
  0xd5   :  { %2083 = vmatprep.subr.bf16.mxu1 %v3010_v29  ;;  %v3086_v28 = vld [vmem:[#allocation7 + $0x208] ss:$16 sps:$4 sm:$0xff]   ;;  %v3091_v29 = vld [vmem:[#allocation7 + $0x3ec] ss:$16 sps:$4 sm:$0xff]  }
  0xd7   :  { %2043 = vmatpush1.bf16.msra.mxu0 %v3005_v31  ;;  %v3094_v31 = vld [vmem:[#allocation7 + $0x4ec] ss:$16 sps:$4 sm:$0xff]  }
  0xd8   :  { %2084 = vmatpush1.bf16.msra.mxu1 %v3008_v32  ;;  %2044 = vmatprep.subr.bf16.mxu0 %v3013_v33  ;;  %v3089_v32 = vld [vmem:[#allocation7 + $0x3e8] ss:$16 sps:$4 sm:$0xff]  }
  0xd9   :  { %2085 = vmatprep.subr.bf16.mxu1 %v3016_v34  ;;  %v3092_v33 = vld [vmem:[#allocation7 + $0x4e8] ss:$16 sps:$4 sm:$0xff]   ;;  %v3097_v34 = vld [vmem:[#allocation7 + $0x3cc] ss:$16 sps:$4 sm:$0xff]  }
  0xdb   :  { %2045 = vmatpush1.bf16.msra.mxu0 %v3011_v35  ;;  %v3100_v35 = vld [vmem:[#allocation7 + $0x4cc] ss:$16 sps:$4 sm:$0xff]  }
  0xdc   :  { %2086 = vmatpush1.bf16.msra.mxu1 %v3014_v36  ;;  %2046 = vmatprep.subr.bf16.mxu0 %v3019_v38  ;;  %v3095_v36 = vld [vmem:[#allocation7 + $0x3c8] ss:$16 sps:$4 sm:$0xff]  }
  0xdd   :  { %2087 = vmatprep.subr.bf16.mxu1 %v3022_v39  ;;  %v3098_v38 = vld [vmem:[#allocation7 + $0x4c8] ss:$16 sps:$4 sm:$0xff]   ;;  %v3103_v39 = vld [vmem:[#allocation7 + $0x3ac] ss:$16 sps:$4 sm:$0xff]  }
  0xdf   :  { %2047 = vmatpush1.bf16.msra.mxu0 %v3017_v41  ;;  %v3106_v41 = vld [vmem:[#allocation7 + $0x4ac] ss:$16 sps:$4 sm:$0xff]  }
  0xe0   :  { %2088 = vmatpush1.bf16.msra.mxu1 %v3020_v49  ;;  %2048 = vmatprep.subr.bf16.mxu0 %v3025_v42  ;;  %v3101_v49 = vld [vmem:[#allocation7 + $0x3a8] ss:$16 sps:$4 sm:$0xff]  }
  0xe1   :  { %2089 = vmatprep.subr.bf16.mxu1 %v3028_v43  ;;  %v3104_v42 = vld [vmem:[#allocation7 + $0x4a8] ss:$16 sps:$4 sm:$0xff]   ;;  %v3109_v43 = vld [vmem:[#allocation7 + $0x38c] ss:$16 sps:$4 sm:$0xff]  }
  0xe3   :  { %2049 = vmatpush1.bf16.msra.mxu0 %v3023_v44  ;;  %v3112_v44 = vld [vmem:[#allocation7 + $0x48c] ss:$16 sps:$4 sm:$0xff]  }
  0xe4   :  { %2090 = vmatpush1.bf16.msra.mxu1 %v3026_v45  ;;  %2050 = vmatprep.subr.bf16.mxu0 %v3031_v46  ;;  %v3107_v45 = vld [vmem:[#allocation7 + $0x388] ss:$16 sps:$4 sm:$0xff]   ;;  %v3115_v46 = vld [vmem:[#allocation7 + $0x36c] ss:$16 sps:$4 sm:$0xff]  }
  0xe5   :  { %2091 = vmatprep.subr.bf16.mxu1 %v3034_v47  ;;  %v3118_v47 = vld [vmem:[#allocation7 + $0x46c] ss:$16 sps:$4 sm:$0xff]  }
  0xe7   :  { %2051 = vmatpush1.bf16.msra.mxu0 %v3029_v48  ;;  %v3113_v48 = vld [vmem:[#allocation7 + $0x368] ss:$16 sps:$4 sm:$0xff]  }
  0xe8   :  { %2092 = vmatpush1.bf16.msra.mxu1 %v3032_v50  ;;  %2052 = vmatprep.subr.bf16.mxu0 %v3037_v51  ;;  %v3116_v50 = vld [vmem:[#allocation7 + $0x468] ss:$16 sps:$4 sm:$0xff]   ;;  %v3124_v51 = vld [vmem:[#allocation7 + $0x44c] ss:$16 sps:$4 sm:$0xff]  }
  0xe9   :  { %2093 = vmatprep.subr.bf16.mxu1 %v3040_v53  ;;  %v3119_v53 = vld [vmem:[#allocation7 + $0x348] ss:$16 sps:$4 sm:$0xff]  }
  0xeb   :  { %2053 = vmatpush1.bf16.msra.mxu0 %v3035_v54  ;;  %v3122_v54 = vld [vmem:[#allocation7 + $0x448] ss:$16 sps:$4 sm:$0xff]  }
  0xec   :  { %2094 = vmatpush1.bf16.msra.mxu1 %v3038_v55  ;;  %2120 = vmatprep.subr.bf16.mxu0 %v3046_v58  ;;  %v3127_v55 = vld [vmem:[#allocation7 + $0x32c] ss:$16 sps:$4 sm:$0xff]   ;;  %v3128_v58 = vld [vmem:[#allocation7 + $0x428] ss:$16 sps:$4 sm:$0xff]  }
  0xed   :  { %2095 = vmatprep.subr.bf16.mxu1 %v3043_v57  ;;  %v3125_v57 = vld [vmem:[#allocation7 + $0x328] ss:$16 sps:$4 sm:$0xff]  }
  0xee   :  { %2071 = vmatmul.mubr.bf16.vlgmr.msra.gmra.mxu0 %v3562_v59 }
  0xef   :  { %2121 = vmatpush1.bf16.msra.mxu0 %v3044_v61  ;;  %2152 = vmatprep.mubr.bf16.mxu0 %v3520_v52  ;;  %v3068_v52 = vld [vmem:[#allocation7 + $0x268] ss:$16 sps:$4 sm:$0xff]   ;;  %v3136_v61 = vld [vmem:[#allocation7 + $0x40c] ss:$16 sps:$4 sm:$0xff]  }
  0xf0   :  { %2096 = vmatpush2.bf16.msra.mxu1 %v3041_v60  ;;  %2122 = vmatprep.subr.bf16.mxu0 %v3052_v63  ;;  %v3133_v60 = vld [vmem:[#allocation7 + $0x30c] ss:$16 sps:$4 sm:$0xff]   ;;  %v3134_v63 = vld [vmem:[#allocation7 + $0x408] ss:$16 sps:$4 sm:$0xff]  }
  0xf1   :  { %2097 = vmatprep.subr.bf16.mxu1 %v3049_v62  ;;  %v3131_v62 = vld [vmem:[#allocation7 + $0x308] ss:$16 sps:$4 sm:$0xff]  }
  0xf3   :  { %2123 = vmatpush1.bf16.msra.mxu0 %v3050_v1  ;;  %v3142_v1 = vld [vmem:[#allocation7 + $0x6ec] ss:$16 sps:$4 sm:$0xff]  }
  0xf4   :  { %2098 = vmatpush2.bf16.msra.mxu1 %v3047_v0  ;;  %2124 = vmatprep.subr.bf16.mxu0 %v3058_v3  ;;  %v3139_v0 = vld [vmem:[#allocation7 + $0x5ec] ss:$16 sps:$4 sm:$0xff]   ;;  %v3140_v3 = vld [vmem:[#allocation7 + $0x6e8] ss:$16 sps:$4 sm:$0xff]  }
  0xf5   :  { %2099 = vmatprep.subr.bf16.mxu1 %v3055_v2  ;;  %v3137_v2 = vld [vmem:[#allocation7 + $0x5e8] ss:$16 sps:$4 sm:$0xff]  }
  0xf7   :  { %2125 = vmatpush1.bf16.msra.mxu0 %v3056_v5  ;;  %v3148_v5 = vld [vmem:[#allocation7 + $0x6cc] ss:$16 sps:$4 sm:$0xff]  }
  0xf8   :  { %2100 = vmatpush2.bf16.msra.mxu1 %v3053_v4  ;;  %2126 = vmatprep.subr.bf16.mxu0 %v3064_v7  ;;  %v3145_v4 = vld [vmem:[#allocation7 + $0x5cc] ss:$16 sps:$4 sm:$0xff]   ;;  %v3146_v7 = vld [vmem:[#allocation7 + $0x6c8] ss:$16 sps:$4 sm:$0xff]  }
  0xf9   :  { %2101 = vmatprep.subr.bf16.mxu1 %v3061_v6  ;;  %v3143_v6 = vld [vmem:[#allocation7 + $0x5c8] ss:$16 sps:$4 sm:$0xff]  }
  0xfb   :  { %2127 = vmatpush1.bf16.msra.mxu0 %v3062_v11  ;;  %v3154_v11 = vld [vmem:[#allocation7 + $0x6ac] ss:$16 sps:$4 sm:$0xff]  }
  0xfc   :  { %2102 = vmatpush2.bf16.msra.mxu1 %v3059_v10  ;;  %2128 = vmatprep.subr.bf16.mxu0 %v3070_v13  ;;  %v3151_v10 = vld [vmem:[#allocation7 + $0x5ac] ss:$16 sps:$4 sm:$0xff]   ;;  %v3152_v13 = vld [vmem:[#allocation7 + $0x6a8] ss:$16 sps:$4 sm:$0xff]  }
  0xfd   :  { %2103 = vmatprep.subr.bf16.mxu1 %v3067_v12  ;;  %v3149_v12 = vld [vmem:[#allocation7 + $0x5a8] ss:$16 sps:$4 sm:$0xff]  }
  0xff   :  { %2129 = vmatpush1.bf16.msra.mxu0 %v3068_v52  ;;  %v3160_v52 = vld [vmem:[#allocation7 + $0x68c] ss:$16 sps:$4 sm:$0xff]  }
 0x100   :  { %2104 = vmatpush2.bf16.msra.mxu1 %v3065_v14  ;;  %2130 = vmatprep.subr.bf16.mxu0 %v3076_v16  ;;  %v3157_v14 = vld [vmem:[#allocation7 + $0x58c] ss:$16 sps:$4 sm:$0xff]  }
 0x101   :  { %2105 = vmatprep.subr.bf16.mxu1 %v3073_v15  ;;  %v3158_v15 = vld [vmem:[#allocation7 + $0x688] ss:$16 sps:$4 sm:$0xff]   ;;  %v3163_v16 = vld [vmem:[#allocation7 + $0x56c] ss:$16 sps:$4 sm:$0xff]  }
 0x103   :  { %2131 = vmatpush1.bf16.msra.mxu0 %v3074_v18  ;;  %v3161_v18 = vld [vmem:[#allocation7 + $0x568] ss:$16 sps:$4 sm:$0xff]  }
 0x104   :  { %2106 = vmatpush2.bf16.msra.mxu1 %v3071_v17  ;;  %2132 = vmatprep.subr.bf16.mxu0 %v3082_v22  ;;  %v3166_v17 = vld [vmem:[#allocation7 + $0x66c] ss:$16 sps:$4 sm:$0xff]  }
 0x105   :  { %2107 = vmatprep.subr.bf16.mxu1 %v3079_v19  ;;  %v3169_v19 = vld [vmem:[#allocation7 + $0x54c] ss:$16 sps:$4 sm:$0xff]  }
 0x106   :  { %v3172_v22 = vld [vmem:[#allocation7 + $0x64c] ss:$16 sps:$4 sm:$0xff]  }
 0x107   :  { %2133 = vmatpush1.bf16.msra.mxu0 %v3080_v24  ;;  %v3170_v24 = vld [vmem:[#allocation7 + $0x648] ss:$16 sps:$4 sm:$0xff]  }
 0x108   :  { %2108 = vmatpush2.bf16.msra.mxu1 %v3077_v23  ;;  %2134 = vmatprep.subr.bf16.mxu0 %v3088_v26  ;;  %v3167_v23 = vld [vmem:[#allocation7 + $0x548] ss:$16 sps:$4 sm:$0xff]   ;;  %v3175_v26 = vld [vmem:[#allocation7 + $0x52c] ss:$16 sps:$4 sm:$0xff]  }
 0x109   :  { %2109 = vmatprep.subr.bf16.mxu1 %v3085_v25  ;;  %v414_v25 = vlaneseq }
 0x10b   :  { %2135 = vmatpush1.bf16.msra.mxu0 %v3086_v28  ;;  %v3173_v28 = vld [vmem:[#allocation7 + $0x528] ss:$16 sps:$4 sm:$0xff]  }
 0x10c   :  { %2110 = vmatpush2.bf16.msra.mxu1 %v3083_v27  ;;  %2136 = vmatprep.subr.bf16.mxu0 %v3091_v29  ;;  %v3178_v27 = vld [vmem:[#allocation7 + $0x62c] ss:$16 sps:$4 sm:$0xff]   ;;  %v3176_v29 = vld [vmem:[#allocation7 + $0x628] ss:$16 sps:$4 sm:$0xff]  }
 0x10d   :  { %2161 = vmatprep.subr.bf16.mxu1 %v3094_v31  ;;  %v3570_v31 = vshrl.u32 %v414_v25, 7 }
 0x10f   :  { %2112 = vmatmul.mubr.bf16.vlgmr.msra.gmra.mxu1 %v3530_v8  ;;  %2137 = vmatpush2.bf16.msra.mxu0 %v3089_v32  ;;  %v3110_v8 = vld [vmem:[#allocation7 + $0x488] ss:$16 sps:$4 sm:$0xff]   ;;  %v3181_v32 = vld [vmem:[#allocation7 + $0x50c] ss:$16 sps:$4 sm:$0xff]  }
 0x110   :  { %2162 = vmatpush1.bf16.msra.mxu1 %v3092_v33  ;;  %2138 = vmatprep.subr.bf16.mxu0 %v3097_v34  ;;  %v3184_v33 = vld [vmem:[#allocation7 + $0x60c] ss:$16 sps:$4 sm:$0xff]   ;;  %v3179_v34 = vld [vmem:[#allocation7 + $0x508] ss:$16 sps:$4 sm:$0xff]  }
 0x111   :  { %2163 = vmatprep.subr.bf16.mxu1 %v3100_v35  ;;  %2193 = vmatprep.mubr.bf16.mxu1 %v3539_v37  ;;  %v3121_v37 = vld [vmem:[#allocation7 + $0x34c] ss:$16 sps:$4 sm:$0xff]   ;;  %v3182_v35 = vld [vmem:[#allocation7 + $0x608] ss:$16 sps:$4 sm:$0xff]  }
 0x113   :  { %2139 = vmatpush2.bf16.msra.mxu0 %v3095_v36  ;;  %v416_v36 = vsub.s32 0, %v3570_v31 }
 0x114   :  { %2164 = vmatpush1.bf16.msra.mxu1 %v3098_v38  ;;  %2140 = vmatprep.subr.bf16.mxu0 %v3103_v39  ;;  %v3573_v38 = vld [vmem:[#allocation8] sm:$0xf]  ;;  %v3187_v39 = vld [vmem:[#allocation7 + $0x7ec] ss:$16 sps:$4 sm:$0xff]  }
 0x115   :  { %2165 = vmatprep.subr.bf16.mxu1 %v3106_v41  ;;  %v3190_v41 = vld [vmem:[#allocation7 + $0x8ec] ss:$16 sps:$4 sm:$0xff]  }
 0x117   :  { %2141 = vmatpush2.bf16.msra.mxu0 %v3101_v49  ;;  %v420_v49 = vsub.s32 1, %v3570_v31 }
 0x118   :  { %2166 = vmatpush1.bf16.msra.mxu1 %v3104_v42  ;;  %2142 = vmatprep.subr.bf16.mxu0 %v3109_v43  ;;  %v417_v42 = vrot.slane %v3573_v38, %v416_v36  ;;  %v3185_v43 = vld [vmem:[#allocation7 + $0x7e8] ss:$16 sps:$4 sm:$0xff]  }
 0x119   :  { %2167 = vmatprep.subr.bf16.mxu1 %v3112_v44  ;;  %v3188_v44 = vld [vmem:[#allocation7 + $0x8e8] ss:$16 sps:$4 sm:$0xff]  }
 0x11b   :  { %2143 = vmatpush2.bf16.msra.mxu0 %v3107_v45  ;;  %v3193_v45 = vld [vmem:[#allocation7 + $0x7cc] ss:$16 sps:$4 sm:$0xff]  }
 0x11c   :  { %2168 = vmatpush1.bf16.msra.mxu1 %v3110_v8  ;;  %2144 = vmatprep.subr.bf16.mxu0 %v3115_v46  ;;  %v3196_v8 = vld [vmem:[#allocation7 + $0x8cc] ss:$16 sps:$4 sm:$0xff]   ;;  %v421_v46 = vrot.slane %v3573_v38, %v420_v49 }
 0x11d   :  { %2169 = vmatprep.subr.bf16.mxu1 %v3118_v47 }
 0x11f   :  { %2145 = vmatpush2.bf16.msra.mxu0 %v3113_v48 }
 0x120   :  { %2170 = vmatpush1.bf16.msra.mxu1 %v3116_v50  ;;  %2146 = vmatprep.subr.bf16.mxu0 %v3121_v37  ;;  %v3191_v37 = vld [vmem:[#allocation7 + $0x7c8] ss:$16 sps:$4 sm:$0xff]  }
 0x121   :  { %2171 = vmatprep.subr.bf16.mxu1 %v3124_v51  ;;  %v3194_v51 = vld [vmem:[#allocation7 + $0x8c8] ss:$16 sps:$4 sm:$0xff]  }
 0x123   :  { %2147 = vmatpush2.bf16.msra.mxu0 %v3119_v53 }
 0x124   :  { %2172 = vmatpush1.bf16.msra.mxu1 %v3122_v54  ;;  %2148 = vmatprep.subr.bf16.mxu0 %v3127_v55  ;;  %v3199_v55 = vld [vmem:[#allocation7 + $0x7ac] ss:$16 sps:$4 sm:$0xff]  }
 0x125   :  { %2173 = vmatprep.subr.bf16.mxu1 %v3130_v56  ;;  %v3202_v56 = vld [vmem:[#allocation7 + $0x8ac] ss:$16 sps:$4 sm:$0xff]  }
 0x127   :  { %2149 = vmatpush2.bf16.msra.mxu0 %v3125_v57 }
 0x128   :  { %2174 = vmatpush1.bf16.msra.mxu1 %v3128_v58  ;;  %2150 = vmatprep.subr.bf16.mxu0 %v3133_v60 }
 0x129   :  { %2175 = vmatprep.subr.bf16.mxu1 %v3136_v61 }
 0x12b   :  { %2151 = vmatpush2.bf16.msra.mxu0 %v3131_v62 }
 0x12c   :  { %2176 = vmatpush1.bf16.msra.mxu1 %v3134_v63  ;;  %2202 = vmatprep.subr.bf16.mxu0 %v3142_v1  ;;  %v3200_v63 = vld [vmem:[#allocation7 + $0x8a8] ss:$16 sps:$4 sm:$0xff]  }
 0x12d   :  { %2177 = vmatprep.subr.bf16.mxu1 %v3139_v0 }
 0x12e   :  { %2153 = vmatmul.mubr.bf16.vlgmr.msra.gmra.mxu0 %v3532_v9  ;;  %v3155_v9 = vld [vmem:[#allocation7 + $0x588] ss:$16 sps:$4 sm:$0xff]  }
 0x12f   :  { %2203 = vmatpush1.bf16.msra.mxu0 %v3140_v3  ;;  %2234 = vmatprep.mubr.bf16.mxu0 %v3544_v40  ;;  %v3164_v40 = vld [vmem:[#allocation7 + $0x668] ss:$16 sps:$4 sm:$0xff]   ;;  %v3208_v3 = vld [vmem:[#allocation7 + $0x88c] ss:$16 sps:$4 sm:$0xff]  }
 0x130   :  { %2178 = vmatpush2.bf16.msra.mxu1 %v3137_v2  ;;  %2204 = vmatprep.subr.bf16.mxu0 %v3148_v5  ;;  %v3205_v2 = vld [vmem:[#allocation7 + $0x78c] ss:$16 sps:$4 sm:$0xff]   ;;  %v3206_v5 = vld [vmem:[#allocation7 + $0x888] ss:$16 sps:$4 sm:$0xff]  }
 0x131   :  { %2179 = vmatprep.subr.bf16.mxu1 %v3145_v4  ;;  %v3203_v4 = vld [vmem:[#allocation7 + $0x788] ss:$16 sps:$4 sm:$0xff]  }
 0x133   :  { %2205 = vmatpush1.bf16.msra.mxu0 %v3146_v7  ;;  %v3209_v7 = vld [vmem:[#allocation7 + $0x768] ss:$16 sps:$4 sm:$0xff]  }
 0x134   :  { %2180 = vmatpush2.bf16.msra.mxu1 %v3143_v6  ;;  %2206 = vmatprep.subr.bf16.mxu0 %v3154_v11  ;;  %v3214_v6 = vld [vmem:[#allocation7 + $0x86c] ss:$16 sps:$4 sm:$0xff]  }
 0x135   :  { %2181 = vmatprep.subr.bf16.mxu1 %v3151_v10  ;;  %v3212_v10 = vld [vmem:[#allocation7 + $0x868] ss:$16 sps:$4 sm:$0xff]   ;;  %v3217_v11 = vld [vmem:[#allocation7 + $0x74c] ss:$16 sps:$4 sm:$0xff]  }
 0x137   :  { %2207 = vmatpush1.bf16.msra.mxu0 %v3152_v13  ;;  %v3215_v13 = vld [vmem:[#allocation7 + $0x748] ss:$16 sps:$4 sm:$0xff]  }
 0x138   :  { %2182 = vmatpush2.bf16.msra.mxu1 %v3149_v12  ;;  %2208 = vmatprep.subr.bf16.mxu0 %v3160_v52  ;;  %v3220_v12 = vld [vmem:[#allocation7 + $0x84c] ss:$16 sps:$4 sm:$0xff]  }
 0x139   :  { %2183 = vmatprep.subr.bf16.mxu1 %v3157_v14  ;;  %v3218_v14 = vld [vmem:[#allocation7 + $0x848] ss:$16 sps:$4 sm:$0xff]   ;;  %v3223_v52 = vld [vmem:[#allocation7 + $0x72c] ss:$16 sps:$4 sm:$0xff]  }
 0x13b   :  { %2209 = vmatpush1.bf16.msra.mxu0 %v3158_v15  ;;  %v3221_v15 = vld [vmem:[#allocation7 + $0x728] ss:$16 sps:$4 sm:$0xff]  }
 0x13c   :  { %2184 = vmatpush2.bf16.msra.mxu1 %v3155_v9  ;;  %2210 = vmatprep.subr.bf16.mxu0 %v3166_v17  ;;  %v3226_v9 = vld [vmem:[#allocation7 + $0x82c] ss:$16 sps:$4 sm:$0xff]  }
 0x13d   :  { %2185 = vmatprep.subr.bf16.mxu1 %v3163_v16  ;;  %v3224_v16 = vld [vmem:[#allocation7 + $0x828] ss:$16 sps:$4 sm:$0xff]   ;;  %v3229_v17 = vld [vmem:[#allocation7 + $0x70c] ss:$16 sps:$4 sm:$0xff]  }
 0x13f   :  { %2211 = vmatpush1.bf16.msra.mxu0 %v3164_v40  ;;  %v3227_v40 = vld [vmem:[#allocation7 + $0x708] ss:$16 sps:$4 sm:$0xff]  }
 0x140   :  { %2186 = vmatpush2.bf16.msra.mxu1 %v3161_v18  ;;  %2212 = vmatprep.subr.bf16.mxu0 %v3172_v22  ;;  %v3232_v18 = vld [vmem:[#allocation7 + $0x80c] ss:$16 sps:$4 sm:$0xff]  }
 0x141   :  { %2187 = vmatprep.subr.bf16.mxu1 %v3169_v19  ;;  %v3230_v19 = vld [vmem:[#allocation7 + $0x808] ss:$16 sps:$4 sm:$0xff]  }
 0x143   :  { %2213 = vmatpush1.bf16.msra.mxu0 %v3170_v24 }
 0x144   :  { %2188 = vmatpush2.bf16.msra.mxu1 %v3167_v23  ;;  %2214 = vmatprep.subr.bf16.mxu0 %v3178_v27 }
 0x145   :  { %2189 = vmatprep.subr.bf16.mxu1 %v3175_v26 }
 0x147   :  { %2215 = vmatpush1.bf16.msra.mxu0 %v3176_v29 }
 0x148   :  { %2190 = vmatpush2.bf16.msra.mxu1 %v3173_v28  ;;  %2216 = vmatprep.subr.bf16.mxu0 %v3184_v33 }
 0x149   :  { %2191 = vmatprep.subr.bf16.mxu1 %v3181_v32 }
 0x14b   :  { %2217 = vmatpush1.bf16.msra.mxu0 %v3182_v35 }
 0x14c   :  { %2192 = vmatpush2.bf16.msra.mxu1 %v3179_v34  ;;  %2218 = vmatprep.subr.bf16.mxu0 %v3187_v39 }
 0x14d   :  { %2243 = vmatprep.subr.bf16.mxu1 %v3190_v41 }
 0x14e   :  { %v1908_v47 = vpop.f32.mrf.mxu0 }
 0x14f   :  { %v1949_v48 = vpop.f32.mrf.mxu1  ;;  %2194 = vmatmul.mubr.bf16.vlgmr.msra.gmra.mxu1 %v3554_v20  ;;  %v1909_v50 = vadd.f32 %v1908_v47, %v417_v42  ;;  %2219 = vmatpush2.bf16.msra.mxu0 %v3185_v43  ;;  %v3197_v20 = vld [vmem:[#allocation7 + $0x7a8] ss:$16 sps:$4 sm:$0xff]   ;;  %v3233_v43 = vld [vmem:[#allocation10 + $0x38] sm:$0xff]  }
 0x150   :  { %2244 = vmatpush1.bf16.msra.mxu1 %v3188_v44  ;;  %v1910_v53 = vpop.f32.mrf.mxu0  ;;  %2220 = vmatprep.subr.bf16.mxu0 %v3193_v45  ;;  %v3234_v44 = vld [vmem:[#allocation10 + $0x30] sm:$0xff]   ;;  %v3235_v45 = vld [vmem:[#allocation10 + $0x28] sm:$0xff]  }
 0x151   :  { %v1951_v54 = vpop.f32.mrf.mxu1  ;;  %2245 = vmatprep.subr.bf16.mxu1 %v3196_v8  ;;  %v1950_v57 = vadd.f32 %v1949_v48, %v1909_v50  ;;  %v1911_v58 = vadd.f32 %v1910_v53, %v421_v46  ;;  %2275 = vmatprep.mubr.bf16.mxu1 %v3439_v30  ;;  %v3211_v30 = vld [vmem:[#allocation7 + $0x76c] ss:$16 sps:$4 sm:$0xff]   ;;  %v3236_v8 = vld [vmem:[#allocation10 + $0x20] sm:$0xff]   ;;  %v3238_v47 = vld [vmem:[#allocation10 + $0x10] sm:$0xff]  }
 0x152   :  { %v1912_v60 = vpop.f32.mrf.mxu0  ;;  %v3237_v46 = vld [vmem:[#allocation10 + $0x18] sm:$0xff]  }
 0x153   :  { %v1953_v61 = vpop.f32.mrf.mxu1  ;;  %v1952_v62 = vadd.f32 %v1951_v54, %v1911_v58  ;;  %2221 = vmatpush2.bf16.msra.mxu0 %v3191_v37  ;;  %v3239_v37 = vld [vmem:[#allocation10 + $0x8] sm:$0xff]   ;;  %v3240_v54 = vld [vmem:[#allocation10] sm:$0xff]  }
 0x154   :  { %2246 = vmatpush1.bf16.msra.mxu1 %v3194_v51  ;;  %v1913_v0 = vpop.f32.mrf.mxu0  ;;  %2222 = vmatprep.subr.bf16.mxu0 %v3199_v55 }
 0x155   :  { %v1954_v1 = vpop.f32.mrf.mxu1  ;;  %2247 = vmatprep.subr.bf16.mxu1 %v3202_v56 }
 0x157   :  { %2223 = vmatpush2.bf16.msra.mxu0 %v3197_v20 }
 0x158   :  { %2248 = vmatpush1.bf16.msra.mxu1 %v3200_v63  ;;  %2224 = vmatprep.subr.bf16.mxu0 %v3205_v2 }
 0x159   :  { %2249 = vmatprep.subr.bf16.mxu1 %v3208_v3  ;;  %v424_v3 = vsub.s32 2, %v3570_v31 }
 0x15b   :  { %2225 = vmatpush2.bf16.msra.mxu0 %v3203_v4  ;;  %v428_v4 = vsub.s32 3, %v3570_v31 }
 0x15c   :  { %2250 = vmatpush1.bf16.msra.mxu1 %v3206_v5  ;;  %2226 = vmatprep.subr.bf16.mxu0 %v3211_v30  ;;  %v425_v5 = vrot.slane %v3573_v38, %v424_v3 }
 0x15d   :  { %2251 = vmatprep.subr.bf16.mxu1 %v3214_v6  ;;  %v429_v30 = vrot.slane %v3573_v38, %v428_v4 }
 0x15f   :  { %2227 = vmatpush2.bf16.msra.mxu0 %v3209_v7 }
 0x160   :  { %2252 = vmatpush1.bf16.msra.mxu1 %v3212_v10  ;;  %2228 = vmatprep.subr.bf16.mxu0 %v3217_v11 }
 0x161   :  { %2253 = vmatprep.subr.bf16.mxu1 %v3220_v12 }
 0x163   :  { %2229 = vmatpush2.bf16.msra.mxu0 %v3215_v13 }
 0x164   :  { %2254 = vmatpush1.bf16.msra.mxu1 %v3218_v14  ;;  %2230 = vmatprep.subr.bf16.mxu0 %v3223_v52 }
 0x165   :  { %2255 = vmatprep.subr.bf16.mxu1 %v3226_v9 }
 0x167   :  { %2231 = vmatpush2.bf16.msra.mxu0 %v3221_v15 }
 0x168   :  { %2256 = vmatpush1.bf16.msra.mxu1 %v3224_v16  ;;  %2232 = vmatprep.subr.bf16.mxu0 %v3229_v17 }
 0x169   :  { %2257 = vmatprep.subr.bf16.mxu1 %v3232_v18 }
 0x16b   :  { %2233 = vmatpush2.bf16.msra.mxu0 %v3227_v40 }
 0x16c   :  { %2258 = vmatpush1.bf16.msra.mxu1 %v3230_v19 }
 0x16e   :  { %2235 = vmatmul.mubr.bf16.vlgmr.msra.gmra.mxu0 %v3556_v21 }
 0x16f   :  { %2276 = vmatmul.mubr.bf16.vlgmr.msra.gmra.mxu1 %v3562_v59  ;;  %v3440_v59 = vmov 0.0  }
 0x170   :  { %2766 = vmatprep.subr.bf16.mxu0 %v3440_v59  ;;  %2782 = vmatprep.mubr.msk.bf16.mxu0 %vm3441_vm0, %v3440_v59 }
 0x171   :  { %2767 = vmatpush3.bf16.msra.mxu0 %v3233_v43 }
 0x172   :  { %2768 = vmatprep.subr.bf16.mxu0 %v3440_v59 }
 0x175   :  { %2769 = vmatpush3.bf16.msra.mxu0 %v3234_v44 }
 0x176   :  { %2770 = vmatprep.subr.bf16.mxu0 %v3440_v59 }
 0x179   :  { %2771 = vmatpush3.bf16.msra.mxu0 %v3235_v45 }
 0x17a   :  { %2772 = vmatprep.subr.bf16.mxu0 %v3440_v59 }
 0x17d   :  { %2773 = vmatpush3.bf16.msra.mxu0 %v3236_v8 }
 0x17e   :  { %2774 = vmatprep.subr.bf16.mxu0 %v3440_v59 }
 0x181   :  { %2775 = vmatpush3.bf16.msra.mxu0 %v3237_v46 }
 0x182   :  { %2776 = vmatprep.subr.bf16.mxu0 %v3440_v59 }
 0x185   :  { %2777 = vmatpush3.bf16.msra.mxu0 %v3238_v47 }
 0x186   :  { %2778 = vmatprep.subr.bf16.mxu0 %v3440_v59 }
 0x189   :  { %2779 = vmatpush3.bf16.msra.mxu0 %v3239_v37 }
 0x18a   :  { %2780 = vmatprep.subr.bf16.mxu0 %v3440_v59 }
 0x18d   :  { %2781 = vmatpush3.bf16.msra.mxu0 %v3240_v54 }
 0x18e   :  { %v1990_v22 = vpop.f32.mrf.mxu0 }
 0x18f   :  { %v2031_v23 = vpop.f32.mrf.mxu1  ;;  %v1991_v24 = vadd.f32 %v1990_v22, %v1950_v57 }
 0x190   :  { %v1992_v25 = vpop.f32.mrf.mxu0 }
 0x191   :  { %v2033_v26 = vpop.f32.mrf.mxu1  ;;  %v2032_v27 = vadd.f32 %v2031_v23, %v1991_v24  ;;  %v1993_v28 = vadd.f32 %v1992_v25, %v1952_v62 }
 0x192   :  { %v1994_v29 = vpop.f32.mrf.mxu0 }
 0x193   :  { %v2035_v32 = vpop.f32.mrf.mxu1  ;;  %v2034_v33 = vadd.f32 %v2033_v26, %v1993_v28 }
 0x194   :  { %v1995_v34 = vpop.f32.mrf.mxu0  ;;  %v2303_v32 = vld [vmem:[#allocation5] sm:$0xff] }
 0x195   :  { %v2036_v35 = vpop.f32.mrf.mxu1 }
 0x1ae   :  { %v2072_v36 = vpop.f32.mrf.mxu0 }
 0x1af   :  { %v2073_v39 = vadd.f32 %v2072_v36, %v2032_v27 }
 0x1b0   :  { %v2074_v41 = vpop.f32.mrf.mxu0 }
 0x1b1   :  { %v2075_v49 = vadd.f32 %v2074_v41, %v2034_v33  ;;  %v2284_v0 = vsub.f32 0.0, %v2073_v39 }
 0x1b2   :  { %v2076_v42 = vpop.f32.mrf.mxu0 }
 0x1b3   :  { %v2290_v63 = vsub.f32 0.0, %v2075_v49  ;;  %v2285_v2 = vmul.f32 1.442695, %v2284_v0 }
 0x1b4   :  { %v2077_v21 = vpop.f32.mrf.mxu0 }
 0x1b5   :  { %v2291_v1 = vmul.f32 1.442695, %v2290_v63 }
 0x1b7   :  { %3241 = vpow2.f32 %v2291_v1 }
 0x1b8   :  { %3243 = vpow2.f32 %v2285_v2 }
 0x1c4   :  { %v3242_v7 = vpop.eup %3241 }
 0x1c5   :  { %v3244_v10 = vpop.eup %3243  ;;  %v2293_v13 = vadd.f32 1.0, %v3242_v7 }
 0x1c6   :  { %v2287_v9 = vadd.f32 1.0, %v3244_v10 }
 0x1c7   :  { %3245 = vrcp.f32 %v2293_v13 }
 0x1c8   :  { %3247 = vrcp.f32 %v2287_v9 }
 0x1cf   :  { %v2113_v48 = vpop.f32.mrf.mxu1 }
 0x1d0   :  { %v2114_v6 = vadd.f32 %v2113_v48, %v425_v5 }
 0x1d1   :  { %v2115_v50 = vpop.f32.mrf.mxu1 }
 0x1d2   :  { %v2116_v11 = vadd.f32 %v2115_v50, %v429_v30 }
 0x1d3   :  { %v2117_v51 = vpop.f32.mrf.mxu1 }
 0x1d4   :  { %v3246_v29 = vpop.eup %3245 }
 0x1d5   :  { %v2118_v53 = vpop.f32.mrf.mxu1  ;;  %v3248_v33 = vpop.eup %3247  ;;  %v2304_v35 = vmul.f32 %v3246_v29, %v2303_v32 }
 0x1ee   :  { %v2154_v55 = vpop.f32.mrf.mxu0 }
 0x1ef   :  { %v2155_v12 = vadd.f32 %v2154_v55, %v2114_v6 }
 0x1f0   :  { %v2156_v56 = vpop.f32.mrf.mxu0 }
 0x1f1   :  { %v2157_v14 = vadd.f32 %v2156_v56, %v2116_v11 }
 0x1f2   :  { %v2158_v57 = vpop.f32.mrf.mxu0 }
 0x1f4   :  { %v2159_v58 = vpop.f32.mrf.mxu0 }
 0x20f   :  { %v2195_v60 = vpop.f32.mrf.mxu1 }
 0x210   :  { %v2196_v52 = vadd.f32 %v2195_v60, %v2155_v12 }
 0x211   :  { %v2197_v61 = vpop.f32.mrf.mxu1 }
 0x212   :  { %v2198_v17 = vadd.f32 %v2197_v61, %v2157_v14 }
 0x213   :  { %v2199_v62 = vpop.f32.mrf.mxu1 }
 0x215   :  { %v2200_v20 = vpop.f32.mrf.mxu1 }
 0x22e   :  { %v2236_v15 = vpop.f32.mrf.mxu0 }
 0x22f   :  { %v2277_v16 = vpop.f32.mrf.mxu1  ;;  %v2237_v18 = vadd.f32 %v2236_v15, %v2196_v52 }
 0x230   :  { %v2238_v40 = vpop.f32.mrf.mxu0 }
 0x231   :  { %v2279_v19 = vpop.f32.mrf.mxu1  ;;  %v2278_v31 = vadd.f32 %v2277_v16, %v2237_v18  ;;  %v2239_v22 = vadd.f32 %v2238_v40, %v2198_v17 }
 0x232   :  { %v2240_v38 = vpop.f32.mrf.mxu0 }
 0x233   :  { %v2281_v23 = vpop.f32.mrf.mxu1  ;;  %3249 = vtanh.f32 %v2278_v31  ;;  %v2280_v24 = vadd.f32 %v2279_v19, %v2239_v22 }
 0x234   :  { %v2241_v25 = vpop.f32.mrf.mxu0 }
 0x235   :  { %v2282_v26 = vpop.f32.mrf.mxu1  ;;  %v2297_v27 = vsub.f32 0.0, %v2280_v24 }
 0x237   :  { %v2298_v28 = vmul.f32 1.442695, %v2297_v27 }
 0x239   :  { %3251 = vpow2.f32 %v2298_v28 }
 0x240   :  { %v3250_v34 = vpop.eup %3249 }
 0x241   :  { %v2305_v36 = vmul.f32 %v3250_v34, %v3248_v33 }
 0x243   :  { %v2306_v39 = vadd.f32 %v2305_v36, %v2304_v35 }
 0x245   :  { %2309 = vst [vmem:[#allocation14] sm:$0xff] %v2306_v39  ;;  %3253 = vtanh.f32 %v2306_v39 }
 0x246   :  { %v3252_v41 = vpop.eup %3251 }
 0x247   :  { %v2300_v49 = vadd.f32 1.0, %v3252_v41 }
 0x249   :  { %3255 = vrcp.f32 %v2300_v49 }
 0x252   :  { %v3254_v42 = vpop.eup %3253 }
 0x256   :  { %v3256_v21 = vpop.eup %3255 }
 0x257   :  { %v2308_v43 = vmul.f32 %v3256_v21, %v3254_v42 }
 0x259   :  { %v2311_v59 = vpack.c.bf16 %v2308_v43, %v2308_v43  ;;  %2310 = vst [vmem:[#allocation13] sm:$0xff] %v2308_v43 }
 0x25b   :  { %2783 = vmatmul.mubr.bf16.vlgmr.msra.gmra.mxu0 %v2311_v59 }
 0x25c   :  { %3388 = shalt.err (!%p3385_p6)
}
 0x25d   :  { %2435 = dma.vmem_to_hbm [thread:$0]  %s2433_s10, 128, %s3603_s8, [#allocation4]  }
 0x25e   :  { %s3397_s15 = scalar_lea.vmem %s2443_s11, 128  ;;  %p3402_p8 = scmp.lt.s32.totalorder %s2443_s11, %s2443_s11 }
 0x25f   :  { %p3398_p7 = scmp.ne.s32.totalorder %s2443_s11, %s3397_s15  ;;  %p3403_p9 = scmp.lt.s32.totalorder %s3397_s15, %s3397_s15 }
 0x261   :  { %p3404_p10 = por %p3403_p9, %p3402_p8 }
 0x263   :  { %p3405_p11 = pnand %p3404_p10, %p3398_p7 }
 0x265   :  { %3408 = shalt.err (!%p3405_p11)
}
 0x266   :  { %2445 = dma.vmem_to_hbm [thread:$0]  %s2443_s11, 128, %s3604_s9, [#allocation15]   ;;  %v2748_v44 = vld [vmem:[#allocation11] ss:$0 sm:$0xff] }
 0x31b   :  { %v2417_v45 = vpop.f32.mrf.mxu0 }
 0x31c   :  { %v2418_v8 = vadd.f32 %v2748_v44, %v2417_v45 }
 0x31d   :  { %v2784_v46 = vpop.f32.mrf.mxu0 }
 0x31e   :  { %2423 = vst [vmem:[%s3602_s7] sm:$0xff] %v2418_v8 }
 0x31f   :  { %v2420_v47 = vpop.f32.mrf.mxu0 }
 0x321   :  { %v2785_v48 = vpop.f32.mrf.mxu0 }
 0x322   :  { %3425 = dma.done.wait [#allocation4], 128  }
 0x323   :  { %3426 = vsyncadd [#allocation4], 4294967168 }
 0x324   :  { %3427 = dma.done.wait [#allocation15], 128  }
 0x325   :  { %3428 = vsyncadd [#allocation15], 4294967168 }
 0x326   :  { %2454 = vsyncpa [#allocation3], 1 }
 0x327   :  { %2455 = vsyncpa [#allocation6], 1 }
 0x328   :  { %2456 = vsyncpa [#allocation9], 1 }
 0x329   :  { %2457 = vsyncpa [#allocation12], 1 }
 0x32a   :  { %2458 = vsyncpa [#allocation4], 1 }
 0x32b   :  { %2459 = vsyncpa [#allocation15], 1 }

</bundles_post_ra>
